<compile_context>
chip_gen: v7x
topology: tpu7x:2x2x1
jax: 0.10.0
libtpu: 0.0.40
codegen_flags: <defaults>
</compile_context>

<pallas_src>
import jax
import jax.numpy as jnp
from jax.experimental import pallas as pl
from jax.experimental.pallas import tpu as pltpu

# Layer dims: original and lane-padded (multiples of 128).
DIMS     = (100, 64, 128, 256, 784)
DIMS_PAD = (128, 128, 128, 256, 896)

# Static lane offsets for the merged constant blocks.
_W123_COLS = (0, 128, 256, 512)            # w1 | w2 | w3   -> (128, 512)
_B_COLS    = (0, 128, 256, 512, 1408)      # b1 | b2 | b3 | b4 -> (1, 1408)


def _round_up(x, m):
    return (x + m - 1) // m * m


def generator_kernel(x_ref, w123_ref, w4_ref, b_ref, o_ref):
    # Static, 128-lane-aligned slices of the merged constant blocks.
    w1 = w123_ref[:, _W123_COLS[0]:_W123_COLS[1]]
    w2 = w123_ref[:, _W123_COLS[1]:_W123_COLS[2]]
    w3 = w123_ref[:, _W123_COLS[2]:_W123_COLS[3]]
    b1 = b_ref[:, _B_COLS[0]:_B_COLS[1]]
    b2 = b_ref[:, _B_COLS[1]:_B_COLS[2]]
    b3 = b_ref[:, _B_COLS[2]:_B_COLS[3]]
    b4 = b_ref[:, _B_COLS[3]:_B_COLS[4]]

    x = x_ref[...]

    # MXU operands in bf16, f32 accumulation; f32 epilogues (v5e-safe).
    h = jnp.dot(x.astype(jnp.bfloat16), w1,
                preferred_element_type=jnp.float32) + b1
    h = jnp.maximum(h, 0.0)                                   # ReLU

    h = jnp.dot(h.astype(jnp.bfloat16), w2,
                preferred_element_type=jnp.float32) + b2
    h = jnp.maximum(h, 0.0)                                   # ReLU

    h = jnp.dot(h.astype(jnp.bfloat16), w3,
                preferred_element_type=jnp.float32) + b3
    h = jnp.maximum(h, 0.0)                                   # ReLU

    h = jnp.dot(h.astype(jnp.bfloat16), w4_ref[...],
                preferred_element_type=jnp.float32) + b4
    o_ref[...] = jnp.tanh(h).astype(o_ref.dtype)              # Tanh -> bf16


def prepare_params(params):
    """One-time pad + cast of the weights/biases (hoisted out of the hot path).

    Returns (w123, w4, bcat):
      w123 (128, 512) bf16 :  [ W1(128,128) | W2(128,128) | W3(128,256) ]
      w4   (256, 896) bf16
      bcat (1, 1408)  f32  :  [ b1(128) | b2(128) | b3(256) | b4(896) ]
    Padded rows/cols/lanes are zero, so there is no leakage into valid lanes.
    """
    (w1, b1), (w2, b2), (w3, b3), (w4, b4) = params

    def pad_w(w, din_p, dout_p):
        din, dout = w.shape
        wp = jnp.zeros((din_p, dout_p), jnp.bfloat16)
        return wp.at[:din, :dout].set(w.astype(jnp.bfloat16))

    def pad_b(b, dout_p):
        bp = jnp.zeros((dout_p,), jnp.float32)
        return bp.at[:b.shape[0]].set(b.astype(jnp.float32))

    w1p = pad_w(w1, DIMS_PAD[0], DIMS_PAD[1])
    w2p = pad_w(w2, DIMS_PAD[1], DIMS_PAD[2])
    w3p = pad_w(w3, DIMS_PAD[2], DIMS_PAD[3])
    w4p = pad_w(w4, DIMS_PAD[3], DIMS_PAD[4])

    w123 = jnp.concatenate([w1p, w2p, w3p], axis=1)               # (128, 512)
    bcat = jnp.concatenate([pad_b(b1, DIMS_PAD[1]), pad_b(b2, DIMS_PAD[2]),
                            pad_b(b3, DIMS_PAD[3]), pad_b(b4, DIMS_PAD[4])]
                           ).reshape(1, -1)                       # (1, 1408)
    return jax.block_until_ready((w123, w4p, bcat))


def _pick_tm(B):
    """Batch tile: 16-aligned (bf16 sublane packing); >=2 grid steps for
    medium batches (v7x megacore sharding); big tiles for very large B."""
    if B <= 16:
        return _round_up(B, 16)
    if B <= 512:
        return min(256, max(16, _round_up(_round_up(B, 16) // 2, 16)))
    if B <= 2048:
        return 256
    return 512


def _make_call(B_pad, tm, single_buffer_consts):
    D_in, D_out = DIMS_PAD[0], DIMS_PAD[-1]

    def const_spec(shape):
        # Constant index_map -> DMA'd once, VMEM-resident across batch steps.
        if single_buffer_consts:
            return pl.BlockSpec(shape, lambda i: (0, 0),
                                pipeline_mode=pl.Buffered(1))
        return pl.BlockSpec(shape, lambda i: (0, 0))

    flops = 2 * B_pad * sum(a * b for a, b in zip(DIMS_PAD[:-1], DIMS_PAD[1:]))
    bytes_accessed = (B_pad * D_in * 4 + B_pad * D_out * 2      # x f32, out bf16
                      + 128 * 512 * 2 + 256 * 896 * 2           # bf16 weights
                      + 1408 * 4)                               # f32 biases

    return pl.pallas_call(
        generator_kernel,
        out_shape=jax.ShapeDtypeStruct((B_pad, D_out), jnp.bfloat16),
        grid=(B_pad // tm,),
        in_specs=[
            pl.BlockSpec((tm, D_in), lambda i: (i, 0)),
            const_spec((DIMS_PAD[0], _W123_COLS[-1])),   # (128, 512)
            const_spec((DIMS_PAD[3], DIMS_PAD[4])),      # (256, 896)
            const_spec((1, _B_COLS[-1])),                # (1, 1408)
        ],
        out_specs=pl.BlockSpec((tm, D_out), lambda i: (i, 0)),
        compiler_params=pltpu.CompilerParams(
            dimension_semantics=("parallel",)),
        cost_estimate=pl.CostEstimate(
            flops=flops,
            transcendentals=B_pad * D_out,
            bytes_accessed=bytes_accessed),
    )


def generator_forward(x, prepared, *, tm=None):
    """x: (B, 100) f32. prepared: output of prepare_params(). Returns (B, 784) bf16."""
    w123, w4p, bcat = prepared
    B = x.shape[0]
    if tm is None:
        tm = _pick_tm(B)
    B_pad = _round_up(B, tm)
    D_in = DIMS_PAD[0]

    xp = jnp.zeros((B_pad, D_in), jnp.float32)
    xp = xp.at[:B, :x.shape[1]].set(x.astype(jnp.float32))

    try:
        out_pad = _make_call(B_pad, tm, True)(xp, w123, w4p, bcat)
    except Exception:
        # Fallback if this JAX build rejects pipeline_mode=pl.Buffered(1).
        out_pad = _make_call(B_pad, tm, False)(xp, w123, w4p, bcat)

    # Slice padded batch rows and padded output lanes back off.
    return out_pad[:B, :DIMS[-1]]


def init_params(key):
    """Deterministic init matching nn.Linear (stored as (in, out), bias (out,))."""
    params = []
    for i, (din, dout) in enumerate(zip(DIMS[:-1], DIMS[1:])):
        kw, kb = jax.random.split(jax.random.fold_in(key, i))
        bound = 1.0 / jnp.sqrt(din)  # PyTorch default U(-1/sqrt(in), 1/sqrt(in))
        w = jax.random.uniform(kw, (din, dout), jnp.float32, -bound, bound)
        b = jax.random.uniform(kb, (dout,), jnp.float32, -bound, bound)
        params.append((w, b))
    return params


def generator_ref(x, params):
    """Pure-JAX f32 reference with identical semantics to the PyTorch module."""
    h = x
    for i, (w, b) in enumerate(params):
        h = h @ w + b
        h = jnp.maximum(h, 0.0) if i < len(params) - 1 else jnp.tanh(h)
    return h


if __name__ == "__main__":
    key = jax.random.PRNGKey(0)
    k_x, k_p = jax.random.split(key)

    batch = 8
    x = jax.random.normal(k_x, (batch, 100), dtype=jnp.float32)  # latent noise
    params = init_params(k_p)
    prepared = prepare_params(params)   # pad/cast once, outside the hot path

    out = jax.block_until_ready(generator_forward(x, prepared))

    assert out.shape == (batch, 784)
    assert out.dtype == jnp.bfloat16
    out_f32 = out.astype(jnp.float32)
    assert bool(jnp.all(jnp.isfinite(out_f32)))
    assert bool(jnp.all(jnp.abs(out_f32) <= 1.0))  # tanh range

    # Numerical check vs. f32 reference (bf16 weights/output => ~1e-2 diffs OK).
    ref = generator_ref(x, params)
    assert bool(jnp.allclose(out_f32, ref, atol=5e-2, rtol=5e-2))

    # Exercise the multi-step batch-tiled path (padded rows, grid >= 2).
    x_big = jax.random.normal(jax.random.fold_in(k_x, 1), (100, 100), jnp.float32)
    out_big = jax.block_until_ready(generator_forward(x_big, prepared))
    ref_big = generator_ref(x_big, params)
    assert out_big.shape == (100, 784)
    assert bool(jnp.allclose(out_big.astype(jnp.float32), ref_big,
                             atol=5e-2, rtol=5e-2))

    print("KERNEL_OK")
</pallas_src>

<mosaic_0001>
module attributes {stable_mosaic.version = 11 : i64} {
  func.func @generator_kernel(%arg0: i32, %arg1: memref<16x128xf32, #tpu.memory_space<vmem>>, %arg2: memref<128x512xbf16, #tpu.memory_space<vmem>>, %arg3: memref<256x896xbf16, #tpu.memory_space<vmem>>, %arg4: memref<1x1408xf32, #tpu.memory_space<vmem>>, %arg5: memref<16x896xbf16, #tpu.memory_space<vmem>>) attributes {dimension_semantics = [#tpu.dimension_semantics<parallel>], iteration_bounds = array<i64: 1>, scalar_prefetch = 0 : i64, scratch_operands = 0 : i64, tpu.core_type = #tpu.core_type<tc>, window_params = [{transform_indices = @transform_0, window_bounds = array<i64: 16, 128>}, {pipeline_mode = #tpu.pipeline_mode<synchronous>, transform_indices = @transform_1, window_bounds = array<i64: 128, 512>}, {pipeline_mode = #tpu.pipeline_mode<synchronous>, transform_indices = @transform_2, window_bounds = array<i64: 256, 896>}, {pipeline_mode = #tpu.pipeline_mode<synchronous>, transform_indices = @transform_3, window_bounds = array<i64: 1, 1408>}, {transform_indices = @transform_4, window_bounds = array<i64: 16, 896>}]} {
    %c0 = arith.constant 0 : index
    %c0_0 = arith.constant 0 : index
    %0 = vector.load %arg2[%c0, %c0_0] : memref<128x512xbf16, #tpu.memory_space<vmem>>, vector<128x128xbf16>
    %c0_1 = arith.constant 0 : index
    %c128 = arith.constant 128 : index
    %1 = vector.load %arg2[%c0_1, %c128] : memref<128x512xbf16, #tpu.memory_space<vmem>>, vector<128x128xbf16>
    %c0_2 = arith.constant 0 : index
    %c256 = arith.constant 256 : index
    %2 = vector.load %arg2[%c0_2, %c256] : memref<128x512xbf16, #tpu.memory_space<vmem>>, vector<128x256xbf16>
    %c0_3 = arith.constant 0 : index
    %c0_4 = arith.constant 0 : index
    %3 = vector.load %arg4[%c0_3, %c0_4] : memref<1x1408xf32, #tpu.memory_space<vmem>>, vector<1x128xf32>
    %c0_5 = arith.constant 0 : index
    %c128_6 = arith.constant 128 : index
    %4 = vector.load %arg4[%c0_5, %c128_6] : memref<1x1408xf32, #tpu.memory_space<vmem>>, vector<1x128xf32>
    %c0_7 = arith.constant 0 : index
    %c256_8 = arith.constant 256 : index
    %5 = vector.load %arg4[%c0_7, %c256_8] : memref<1x1408xf32, #tpu.memory_space<vmem>>, vector<1x256xf32>
    %c0_9 = arith.constant 0 : index
    %c512 = arith.constant 512 : index
    %6 = vector.load %arg4[%c0_9, %c512] : memref<1x1408xf32, #tpu.memory_space<vmem>>, vector<1x896xf32>
    %c0_10 = arith.constant 0 : index
    %c0_11 = arith.constant 0 : index
    %7 = vector.load %arg1[%c0_10, %c0_11] : memref<16x128xf32, #tpu.memory_space<vmem>>, vector<16x128xf32>
    %8 = arith.truncf %7 : vector<16x128xf32> to vector<16x128xbf16>
    %cst = arith.constant dense<0.000000e+00> : vector<16x128xf32>
    %9 = tpu.matmul %8, %0, %cst {dimension_numbers = #tpu.dot_dimension_numbers<[1], [0], [0], [1], [0, 0, 1, 1], [], []>} : vector<16x128xbf16>, vector<128x128xbf16>, vector<16x128xf32> -> vector<16x128xf32>
    %10 = vector.broadcast %3 : vector<1x128xf32> to vector<16x128xf32>
    %11 = arith.addf %9, %10 : vector<16x128xf32>
    %cst_12 = arith.constant 0.000000e+00 : f32
    %12 = vector.broadcast %cst_12 : f32 to vector<16x128xf32>
    %13 = arith.maximumf %11, %12 : vector<16x128xf32>
    %14 = arith.truncf %13 : vector<16x128xf32> to vector<16x128xbf16>
    %cst_13 = arith.constant dense<0.000000e+00> : vector<16x128xf32>
    %15 = tpu.matmul %14, %1, %cst_13 {dimension_numbers = #tpu.dot_dimension_numbers<[1], [0], [0], [1], [0, 0, 1, 1], [], []>} : vector<16x128xbf16>, vector<128x128xbf16>, vector<16x128xf32> -> vector<16x128xf32>
    %16 = vector.broadcast %4 : vector<1x128xf32> to vector<16x128xf32>
    %17 = arith.addf %15, %16 : vector<16x128xf32>
    %cst_14 = arith.constant 0.000000e+00 : f32
    %18 = vector.broadcast %cst_14 : f32 to vector<16x128xf32>
    %19 = arith.maximumf %17, %18 : vector<16x128xf32>
    %20 = arith.truncf %19 : vector<16x128xf32> to vector<16x128xbf16>
    %cst_15 = arith.constant dense<0.000000e+00> : vector<16x256xf32>
    %21 = tpu.matmul %20, %2, %cst_15 {dimension_numbers = #tpu.dot_dimension_numbers<[1], [0], [0], [1], [0, 0, 1, 1], [], []>} : vector<16x128xbf16>, vector<128x256xbf16>, vector<16x256xf32> -> vector<16x256xf32>
    %22 = vector.broadcast %5 : vector<1x256xf32> to vector<16x256xf32>
    %23 = arith.addf %21, %22 : vector<16x256xf32>
    %cst_16 = arith.constant 0.000000e+00 : f32
    %24 = vector.broadcast %cst_16 : f32 to vector<16x256xf32>
    %25 = arith.maximumf %23, %24 : vector<16x256xf32>
    %26 = arith.truncf %25 : vector<16x256xf32> to vector<16x256xbf16>
    %c0_17 = arith.constant 0 : index
    %c0_18 = arith.constant 0 : index
    %27 = vector.load %arg3[%c0_17, %c0_18] : memref<256x896xbf16, #tpu.memory_space<vmem>>, vector<256x896xbf16>
    %cst_19 = arith.constant dense<0.000000e+00> : vector<16x896xf32>
    %28 = tpu.matmul %26, %27, %cst_19 {dimension_numbers = #tpu.dot_dimension_numbers<[1], [0], [0], [1], [0, 0, 1, 1], [], []>} : vector<16x256xbf16>, vector<256x896xbf16>, vector<16x896xf32> -> vector<16x896xf32>
    %29 = vector.broadcast %6 : vector<1x896xf32> to vector<16x896xf32>
    %30 = arith.addf %28, %29 : vector<16x896xf32>
    %31 = math.tanh %30 : vector<16x896xf32>
    %32 = arith.truncf %31 : vector<16x896xf32> to vector<16x896xbf16>
    %c0_20 = arith.constant 0 : index
    %c0_21 = arith.constant 0 : index
    %33 = vector.load %arg5[%c0_20, %c0_21] : memref<16x896xbf16, #tpu.memory_space<vmem>>, vector<16x896xbf16>
    tpu.vector_store %arg5[%c0_20, %c0_21], %32 {strides = array<i32>} : memref<16x896xbf16, #tpu.memory_space<vmem>>, vector<16x896xbf16>,
    return
  }
  func.func @transform_0(%arg0: i32) -> (i32, i32) {
    %c0_i32 = arith.constant 0 : i32
    %c0_i32_0 = arith.constant 0 : i32
    return %arg0, %c0_i32 : i32, i32
  }
  func.func @transform_1(%arg0: i32) -> (i32, i32) {
    %c0_i32 = arith.constant 0 : i32
    %c0_i32_0 = arith.constant 0 : i32
    %c0_i32_1 = arith.constant 0 : i32
    return %c0_i32, %c0_i32_0 : i32, i32
  }
  func.func @transform_2(%arg0: i32) -> (i32, i32) {
    %c0_i32 = arith.constant 0 : i32
    %c0_i32_0 = arith.constant 0 : i32
    %c0_i32_1 = arith.constant 0 : i32
    return %c0_i32, %c0_i32_0 : i32, i32
  }
  func.func @transform_3(%arg0: i32) -> (i32, i32) {
    %c0_i32 = arith.constant 0 : i32
    %c0_i32_0 = arith.constant 0 : i32
    %c0_i32_1 = arith.constant 0 : i32
    return %c0_i32, %c0_i32_0 : i32, i32
  }
  func.func @transform_4(%arg0: i32) -> (i32, i32) {
    %c0_i32 = arith.constant 0 : i32
    %c0_i32_0 = arith.constant 0 : i32
    return %arg0, %c0_i32 : i32, i32
  }
}

module attributes {stable_mosaic.version = 11 : i64} {
  func.func @generator_kernel(%arg0: i32, %arg1: memref<16x128xf32, #tpu.memory_space<vmem>>, %arg2: memref<128x512xbf16, #tpu.memory_space<vmem>>, %arg3: memref<256x896xbf16, #tpu.memory_space<vmem>>, %arg4: memref<1x1408xf32, #tpu.memory_space<vmem>>, %arg5: memref<16x896xbf16, #tpu.memory_space<vmem>>) attributes {dimension_semantics = [#tpu.dimension_semantics<parallel>], iteration_bounds = array<i64: 1>, scalar_prefetch = 0 : i64, scratch_operands = 0 : i64, tpu.core_type = #tpu.core_type<tc>, window_params = [{transform_indices = @transform_0, window_bounds = array<i64: 16, 128>}, {pipeline_mode = #tpu.pipeline_mode<synchronous>, transform_indices = @transform_1, window_bounds = array<i64: 128, 512>}, {pipeline_mode = #tpu.pipeline_mode<synchronous>, transform_indices = @transform_2, window_bounds = array<i64: 256, 896>}, {pipeline_mode = #tpu.pipeline_mode<synchronous>, transform_indices = @transform_3, window_bounds = array<i64: 1, 1408>}, {transform_indices = @transform_4, window_bounds = array<i64: 16, 896>}]} {
    %c0 = arith.constant 0 : index
    %c0_0 = arith.constant 0 : index
    %0 = vector.load %arg2[%c0, %c0_0] : memref<128x512xbf16, #tpu.memory_space<vmem>>, vector<128x128xbf16>
    %c0_1 = arith.constant 0 : index
    %c128 = arith.constant 128 : index
    %1 = vector.load %arg2[%c0_1, %c128] : memref<128x512xbf16, #tpu.memory_space<vmem>>, vector<128x128xbf16>
    %c0_2 = arith.constant 0 : index
    %c256 = arith.constant 256 : index
    %2 = vector.load %arg2[%c0_2, %c256] : memref<128x512xbf16, #tpu.memory_space<vmem>>, vector<128x256xbf16>
    %c0_3 = arith.constant 0 : index
    %c0_4 = arith.constant 0 : index
    %3 = vector.load %arg4[%c0_3, %c0_4] : memref<1x1408xf32, #tpu.memory_space<vmem>>, vector<1x128xf32>
    %c0_5 = arith.constant 0 : index
    %c128_6 = arith.constant 128 : index
    %4 = vector.load %arg4[%c0_5, %c128_6] : memref<1x1408xf32, #tpu.memory_space<vmem>>, vector<1x128xf32>
    %c0_7 = arith.constant 0 : index
    %c256_8 = arith.constant 256 : index
    %5 = vector.load %arg4[%c0_7, %c256_8] : memref<1x1408xf32, #tpu.memory_space<vmem>>, vector<1x256xf32>
    %c0_9 = arith.constant 0 : index
    %c512 = arith.constant 512 : index
    %6 = vector.load %arg4[%c0_9, %c512] : memref<1x1408xf32, #tpu.memory_space<vmem>>, vector<1x896xf32>
    %c0_10 = arith.constant 0 : index
    %c0_11 = arith.constant 0 : index
    %7 = vector.load %arg1[%c0_10, %c0_11] : memref<16x128xf32, #tpu.memory_space<vmem>>, vector<16x128xf32>
    %8 = arith.truncf %7 : vector<16x128xf32> to vector<16x128xbf16>
    %cst = arith.constant dense<0.000000e+00> : vector<16x128xf32>
    %9 = tpu.matmul %8, %0, %cst {dimension_numbers = #tpu.dot_dimension_numbers<[1], [0], [0], [1], [0, 0, 1, 1], [], []>} : vector<16x128xbf16>, vector<128x128xbf16>, vector<16x128xf32> -> vector<16x128xf32>
    %10 = vector.broadcast %3 : vector<1x128xf32> to vector<16x128xf32>
    %11 = arith.addf %9, %10 : vector<16x128xf32>
    %cst_12 = arith.constant 0.000000e+00 : f32
    %12 = vector.broadcast %cst_12 : f32 to vector<16x128xf32>
    %13 = arith.maximumf %11, %12 : vector<16x128xf32>
    %14 = arith.truncf %13 : vector<16x128xf32> to vector<16x128xbf16>
    %cst_13 = arith.constant dense<0.000000e+00> : vector<16x128xf32>
    %15 = tpu.matmul %14, %1, %cst_13 {dimension_numbers = #tpu.dot_dimension_numbers<[1], [0], [0], [1], [0, 0, 1, 1], [], []>} : vector<16x128xbf16>, vector<128x128xbf16>, vector<16x128xf32> -> vector<16x128xf32>
    %16 = vector.broadcast %4 : vector<1x128xf32> to vector<16x128xf32>
    %17 = arith.addf %15, %16 : vector<16x128xf32>
    %cst_14 = arith.constant 0.000000e+00 : f32
    %18 = vector.broadcast %cst_14 : f32 to vector<16x128xf32>
    %19 = arith.maximumf %17, %18 : vector<16x128xf32>
    %20 = arith.truncf %19 : vector<16x128xf32> to vector<16x128xbf16>
    %cst_15 = arith.constant dense<0.000000e+00> : vector<16x256xf32>
    %21 = tpu.matmul %20, %2, %cst_15 {dimension_numbers = #tpu.dot_dimension_numbers<[1], [0], [0], [1], [0, 0, 1, 1], [], []>} : vector<16x128xbf16>, vector<128x256xbf16>, vector<16x256xf32> -> vector<16x256xf32>
    %22 = vector.broadcast %5 : vector<1x256xf32> to vector<16x256xf32>
    %23 = arith.addf %21, %22 : vector<16x256xf32>
    %cst_16 = arith.constant 0.000000e+00 : f32
    %24 = vector.broadcast %cst_16 : f32 to vector<16x256xf32>
    %25 = arith.maximumf %23, %24 : vector<16x256xf32>
    %26 = arith.truncf %25 : vector<16x256xf32> to vector<16x256xbf16>
    %c0_17 = arith.constant 0 : index
    %c0_18 = arith.constant 0 : index
    %27 = vector.load %arg3[%c0_17, %c0_18] : memref<256x896xbf16, #tpu.memory_space<vmem>>, vector<256x896xbf16>
    %cst_19 = arith.constant dense<0.000000e+00> : vector<16x896xf32>
    %28 = tpu.matmul %26, %27, %cst_19 {dimension_numbers = #tpu.dot_dimension_numbers<[1], [0], [0], [1], [0, 0, 1, 1], [], []>} : vector<16x256xbf16>, vector<256x896xbf16>, vector<16x896xf32> -> vector<16x896xf32>
    %29 = vector.broadcast %6 : vector<1x896xf32> to vector<16x896xf32>
    %30 = arith.addf %28, %29 : vector<16x896xf32>
    %31 = math.tanh %30 : vector<16x896xf32>
    %32 = arith.truncf %31 : vector<16x896xf32> to vector<16x896xbf16>
    %c0_20 = arith.constant 0 : index
    %c0_21 = arith.constant 0 : index
    %33 = vector.load %arg5[%c0_20, %c0_21] : memref<16x896xbf16, #tpu.memory_space<vmem>>, vector<16x896xbf16>
    tpu.vector_store %arg5[%c0_20, %c0_21], %32 {strides = array<i32>} : memref<16x896xbf16, #tpu.memory_space<vmem>>, vector<16x896xbf16>,
    return
  }
  func.func @transform_0(%arg0: i32) -> (i32, i32) {
    %c0_i32 = arith.constant 0 : i32
    %c0_i32_0 = arith.constant 0 : i32
    return %arg0, %c0_i32 : i32, i32
  }
  func.func @transform_1(%arg0: i32) -> (i32, i32) {
    %c0_i32 = arith.constant 0 : i32
    %c0_i32_0 = arith.constant 0 : i32
    %c0_i32_1 = arith.constant 0 : i32
    return %c0_i32, %c0_i32_0 : i32, i32
  }
  func.func @transform_2(%arg0: i32) -> (i32, i32) {
    %c0_i32 = arith.constant 0 : i32
    %c0_i32_0 = arith.constant 0 : i32
    %c0_i32_1 = arith.constant 0 : i32
    return %c0_i32, %c0_i32_0 : i32, i32
  }
  func.func @transform_3(%arg0: i32) -> (i32, i32) {
    %c0_i32 = arith.constant 0 : i32
    %c0_i32_0 = arith.constant 0 : i32
    %c0_i32_1 = arith.constant 0 : i32
    return %c0_i32, %c0_i32_0 : i32, i32
  }
  func.func @transform_4(%arg0: i32) -> (i32, i32) {
    %c0_i32 = arith.constant 0 : i32
    %c0_i32_0 = arith.constant 0 : i32
    return %arg0, %c0_i32 : i32, i32
  }
}

</mosaic_0001>

<bundles_post_ra>
// kernel: tpu_custom_call.1
= control target key start
LH: loop header
LB: loop body
LE: loop exit
PB: predicated region body
PF: predicated region fallthrough
CT: control target
= control target key end

     0   :  { %9 = vsyncpa [#allocation3], 0  ;;  %s2158_s0 = inlined_call_operand.hbm [shape: f32[16,128], index: 0, kind: input, shape index: {}]   ;;  %s2159_s1 = inlined_call_operand.hbm [shape: bf16[128,512], index: 1, kind: input, shape index: {}]   ;;  %s2160_s2 = inlined_call_operand.hbm [shape: bf16[256,896], index: 2, kind: input, shape index: {}]   ;;  %s2161_s3 = inlined_call_operand.vmem [shape: f32[1,1408], index: 3, kind: input, shape index: {}]   ;;  %s2162_s4 = inlined_call_operand.hbm [shape: bf16[16,896], index: 4, kind: output, shape index: {}]  }
   0x1   :  { %10 = vsyncpa [#allocation6], 0 }
   0x2   :  { %11 = vsyncpa [#allocation4], 0  ;;  %s2022_s15 = smov [#allocation5]   ;;  %s1928_s19 = scalar_lea.hbm %s2159_s1, 4096 }
   0x3   :  { %s29_s16 = sshll.u32 %s2022_s15, 4  ;;  %p1929_p0 = scmp.ne.s32.totalorder %s2159_s1, %s1928_s19  ;;  %s30_s16 = int_to_ptr.vmem [resolvable:$true] %s29_s16 }
   0x4   :  { %p1932_p1 = scmp.lt.u32.totalorder %s1928_s19, %s2159_s1 }
   0x6   :  { %p1934_p2 = pnand %p1932_p1, %p1929_p0 }
   0x8   :  { %1937 = shalt.err (!%p1934_p2)
}
   0x9   :  { %s1938_s24 = scalar_lea.vmem %s30_s16, 4096  ;;  %p1943_p4 = scmp.lt.s32.totalorder %s30_s16, %s30_s16 }
   0xa   :  { %p1939_p3 = scmp.ne.s32.totalorder %s30_s16, %s1938_s24  ;;  %p1944_p5 = scmp.lt.s32.totalorder %s1938_s24, %s1938_s24 }
   0xc   :  { %p1945_p6 = por %p1944_p5, %p1943_p4 }
   0xe   :  { %p1946_p7 = pnand %p1945_p6, %p1939_p3 }
  0x10   :  { %1949 = shalt.err (!%p1946_p7)
}
  0x11   :  { %s2023_s25 = smov 256   ;;  %s2024_s26 = smov 16  }
  0x12   :  { %35 = dma.hbm_to_vmem [thread:$0]  %s2159_s1, 4096, %s30_s16, [#allocation6], %s2023_s25, %s2023_s25, %s2024_s26  }
  0x13   :  { %s2025_s29 = smov [#allocation2]   ;;  %s1950_s7 = scalar_lea.hbm %s2158_s0, 256 }
  0x14   :  { %s17_s30 = sshll.u32 %s2025_s29, 4  ;;  %p1951_p8 = scmp.ne.s32.totalorder %s2158_s0, %s1950_s7  ;;  %s18_s30 = int_to_ptr.vmem [resolvable:$true] %s17_s30 }
  0x15   :  { %p1954_p9 = scmp.lt.u32.totalorder %s1950_s7, %s2158_s0 }
  0x17   :  { %p1956_p10 = pnand %p1954_p9, %p1951_p8 }
  0x19   :  { %1959 = shalt.err (!%p1956_p10)
}
  0x1a   :  { %s1960_s12 = scalar_lea.vmem %s18_s30, 256  ;;  %p1965_p12 = scmp.lt.s32.totalorder %s18_s30, %s18_s30 }
  0x1b   :  { %p1961_p11 = scmp.ne.s32.totalorder %s18_s30, %s1960_s12  ;;  %p1966_p13 = scmp.lt.s32.totalorder %s1960_s12, %s1960_s12 }
  0x1d   :  { %p1967_p0 = por %p1966_p13, %p1965_p12 }
  0x1f   :  { %p1968_p1 = pnand %p1967_p0, %p1961_p11 }
  0x21   :  { %1971 = shalt.err (!%p1968_p1)
}
  0x22   :  { %s2026_s1 = smov 128   ;;  %s2027_s13 = smov 8  }
  0x23   :  { %23 = dma.hbm_to_vmem [thread:$0]  %s2158_s0, 256, %s18_s30, [#allocation3], %s2026_s1, %s2026_s1, %s2027_s13  }
  0x24   :  { %s2028_s16 = smov [#allocation7]   ;;  %s1972_s20 = scalar_lea.hbm %s2160_s2, 14336 }
  0x25   :  { %s41_s17 = sshll.u32 %s2028_s16, 4  ;;  %p1973_p2 = scmp.ne.s32.totalorder %s2160_s2, %s1972_s20  ;;  %s42_s17 = int_to_ptr.vmem [resolvable:$true] %s41_s17 }
  0x26   :  { %p1976_p3 = scmp.lt.u32.totalorder %s1972_s20, %s2160_s2 }
  0x28   :  { %p1978_p4 = pnand %p1976_p3, %p1973_p2 }
  0x2a   :  { %1981 = shalt.err (!%p1978_p4)
}
  0x2b   :  { %s1982_s25 = scalar_lea.vmem %s42_s17, 14336  ;;  %p1987_p6 = scmp.lt.s32.totalorder %s42_s17, %s42_s17 }
  0x2c   :  { %p1983_p5 = scmp.ne.s32.totalorder %s42_s17, %s1982_s25  ;;  %p1988_p7 = scmp.lt.s32.totalorder %s1982_s25, %s1982_s25 }
  0x2e   :  { %p1989_p8 = por %p1988_p7, %p1987_p6 }
  0x30   :  { %p1990_p9 = pnand %p1989_p8, %p1983_p5 }
  0x32   :  { %1993 = shalt.err (!%p1990_p9)
}
  0x33   :  { %s2029_s0 = smov 448   ;;  %s2030_s26 = smov 28  }
  0x34   :  { %47 = dma.hbm_to_vmem [thread:$0]  %s2160_s2, 14336, %s42_s17, [#allocation6], %s2029_s0, %s2029_s0, %s2030_s26  }
  0x35   :  { %2016 = dma.done.wait [#allocation3], 256  }
  0x36   :  { %2017 = vsyncadd [#allocation3], 4294967040 }
  0x37   :  { %2018 = dma.done.wait [#allocation6], 18432  }
  0x38   :  { %2019 = vsyncadd [#allocation6], 4294948864  ;;  %v2031_v0 = vmov 0.0   ;;  %vm2032_vm0 = vmmov 0   ;;  %v1700_v1 = vld [vmem:[#allocation5] ss:$16 sps:$4 sm:$0xff]  }
  0x39   :  { %1647 = vmatprep.subr.bf16.mxu0 %v2031_v0  ;;  %1663 = vmatprep.mubr.msk.bf16.mxu0 %vm2032_vm0, %v2031_v0  ;;  %v1701_v2 = vld [vmem:[#allocation5 + $0x20] ss:$16 sps:$4 sm:$0xff]   ;;  %v1708_v4 = vld [vmem:[#allocation5 + $0x4] ss:$16 sps:$4 sm:$0xff]   ;;  %v113_v15 = vld [vmem:[#allocation2 + $0x8] sm:$0xff]  ;;  %v2033_v46 = vmov 0  }
  0x3a   :  { %1667 = vmatprep.subr.bf16.mxu1 %v2031_v0  ;;  %1683 = vmatprep.mubr.msk.bf16.mxu1 %vm2032_vm0, %v2031_v0  ;;  %v1702_v3 = vld [vmem:[#allocation5 + $0x40] ss:$16 sps:$4 sm:$0xff]   ;;  %v1709_v6 = vld [vmem:[#allocation5 + $0x24] ss:$16 sps:$4 sm:$0xff]   ;;  %v1716_v20 = vld [vmem:[#allocation5 + $0x8] ss:$16 sps:$4 sm:$0xff]  }
  0x3b   :  { %1648 = vmatpush3.bf16.msra.mxu0 %v1700_v1  ;;  %v1703_v5 = vld [vmem:[#allocation5 + $0x60] ss:$16 sps:$4 sm:$0xff]   ;;  %1668 = vmatpush3.bf16.msra.mxu1 %v1708_v4  ;;  %v1710_v8 = vld [vmem:[#allocation5 + $0x44] ss:$16 sps:$4 sm:$0xff]   ;;  %v1718_v21 = vld [vmem:[#allocation5 + $0xc] ss:$16 sps:$4 sm:$0xff]  }
  0x3c   :  { %1649 = vmatprep.subr.bf16.mxu0 %v2031_v0  ;;  %1669 = vmatprep.subr.bf16.mxu1 %v2031_v0  ;;  %v1704_v7 = vld [vmem:[#allocation5 + $0x80] ss:$16 sps:$4 sm:$0xff]   ;;  %v1711_v10 = vld [vmem:[#allocation5 + $0x64] ss:$16 sps:$4 sm:$0xff]   ;;  %v1721_v22 = vld [vmem:[#allocation5 + $0x2c] ss:$16 sps:$4 sm:$0xff]  }
  0x3d   :  { %v1705_v9 = vld [vmem:[#allocation5 + $0xa0] ss:$16 sps:$4 sm:$0xff]   ;;  %v1712_v12 = vld [vmem:[#allocation5 + $0x84] ss:$16 sps:$4 sm:$0xff]   ;;  %v1719_v23 = vld [vmem:[#allocation5 + $0x28] ss:$16 sps:$4 sm:$0xff]  }
  0x3e   :  { %v1706_v11 = vld [vmem:[#allocation5 + $0xc0] ss:$16 sps:$4 sm:$0xff]   ;;  %v1713_v16 = vld [vmem:[#allocation5 + $0xa4] ss:$16 sps:$4 sm:$0xff]   ;;  %v1724_v24 = vld [vmem:[#allocation5 + $0x4c] ss:$16 sps:$4 sm:$0xff]  }
  0x3f   :  { %1650 = vmatpush3.bf16.msra.mxu0 %v1701_v2  ;;  %1670 = vmatpush3.bf16.msra.mxu1 %v1709_v6  ;;  %v1707_v13 = vld [vmem:[#allocation5 + $0xe0] ss:$16 sps:$4 sm:$0xff]   ;;  %v1714_v18 = vld [vmem:[#allocation5 + $0xc4] ss:$16 sps:$4 sm:$0xff]   ;;  %v1722_v25 = vld [vmem:[#allocation5 + $0x48] ss:$16 sps:$4 sm:$0xff]  }
  0x40   :  { %1651 = vmatprep.subr.bf16.mxu0 %v2031_v0  ;;  %1671 = vmatprep.subr.bf16.mxu1 %v2031_v0  ;;  %v112_v14 = vld [vmem:[#allocation2] sm:$0xff]  ;;  %v1727_v26 = vld [vmem:[#allocation5 + $0x6c] ss:$16 sps:$4 sm:$0xff]   ;;  %v1725_v27 = vld [vmem:[#allocation5 + $0x68] ss:$16 sps:$4 sm:$0xff]  }
  0x41   :  { %v114_v17 = vpack.c.bf16 %v113_v15, %v112_v14  ;;  %v1715_v19 = vld [vmem:[#allocation5 + $0xe4] ss:$16 sps:$4 sm:$0xff]   ;;  %v1730_v28 = vld [vmem:[#allocation5 + $0x8c] ss:$16 sps:$4 sm:$0xff]   ;;  %v1728_v29 = vld [vmem:[#allocation5 + $0x88] ss:$16 sps:$4 sm:$0xff]  }
  0x42   :  { %v1733_v30 = vld [vmem:[#allocation5 + $0xac] ss:$16 sps:$4 sm:$0xff]   ;;  %v1731_v31 = vld [vmem:[#allocation5 + $0xa8] ss:$16 sps:$4 sm:$0xff]   ;;  %v1445_v32 = vld [vmem:[%s2161_s3] ss:$0 sm:$0xff] }
  0x43   :  { %1652 = vmatpush3.bf16.msra.mxu0 %v1702_v3  ;;  %1672 = vmatpush3.bf16.msra.mxu1 %v1710_v8  ;;  %v1736_v42 = vld [vmem:[#allocation5 + $0xcc] ss:$16 sps:$4 sm:$0xff]   ;;  %v1734_v43 = vld [vmem:[#allocation5 + $0xc8] ss:$16 sps:$4 sm:$0xff]   ;;  %v1742_v48 = vld [vmem:[#allocation7 + $0x4] ss:$28 sps:$4 sm:$0xff]  }
  0x44   :  { %1653 = vmatprep.subr.bf16.mxu0 %v2031_v0  ;;  %1673 = vmatprep.subr.bf16.mxu1 %v2031_v0  ;;  %v1739_v44 = vld [vmem:[#allocation5 + $0xec] ss:$16 sps:$4 sm:$0xff]   ;;  %v1737_v45 = vld [vmem:[#allocation5 + $0xe8] ss:$16 sps:$4 sm:$0xff]   ;;  %v1754_v52 = vld [vmem:[#allocation7 + $0x74] ss:$28 sps:$4 sm:$0xff]  }
  0x45   :  { %v1740_v47 = vld [vmem:[#allocation7] ss:$28 sps:$4 sm:$0xff]   ;;  %v1745_v49 = vld [vmem:[#allocation7 + $0xc] ss:$28 sps:$4 sm:$0xff]   ;;  %v1746_v51 = vld [vmem:[#allocation7 + $0x38] ss:$28 sps:$4 sm:$0xff]  }
  0x46   :  { %v1748_v50 = vld [vmem:[#allocation7 + $0x3c] ss:$28 sps:$4 sm:$0xff]   ;;  %v1752_v53 = vld [vmem:[#allocation7 + $0x70] ss:$28 sps:$4 sm:$0xff]   ;;  %v1758_v55 = vld [vmem:[#allocation7 + $0xa8] ss:$28 sps:$4 sm:$0xff]  }
  0x47   :  { %1654 = vmatpush3.bf16.msra.mxu0 %v1703_v5  ;;  %1674 = vmatpush3.bf16.msra.mxu1 %v1711_v10  ;;  %v1760_v54 = vld [vmem:[#allocation7 + $0xac] ss:$28 sps:$4 sm:$0xff]   ;;  %v1766_v56 = vld [vmem:[#allocation7 + $0xe4] ss:$28 sps:$4 sm:$0xff]   ;;  %v1772_v58 = vld [vmem:[#allocation7 + $0x11c] ss:$28 sps:$4 sm:$0xff]  }
  0x48   :  { %1655 = vmatprep.subr.bf16.mxu0 %v2031_v0  ;;  %1675 = vmatprep.subr.bf16.mxu1 %v2031_v0  ;;  %v1764_v57 = vld [vmem:[#allocation7 + $0xe0] ss:$28 sps:$4 sm:$0xff]   ;;  %v1770_v59 = vld [vmem:[#allocation7 + $0x118] ss:$28 sps:$4 sm:$0xff]   ;;  %v1776_v61 = vld [vmem:[#allocation7 + $0x150] ss:$28 sps:$4 sm:$0xff]  }
  0x49   :  { %v1778_v60 = vld [vmem:[#allocation7 + $0x154] ss:$28 sps:$4 sm:$0xff]   ;;  %v1784_v62 = vld [vmem:[#allocation7 + $0x18c] ss:$28 sps:$4 sm:$0xff]   ;;  %v1788_v1 = vld [vmem:[#allocation7 + $0x1c0] ss:$28 sps:$4 sm:$0xff]  }
  0x4a   :  { %v1782_v63 = vld [vmem:[#allocation7 + $0x188] ss:$28 sps:$4 sm:$0xff]   ;;  %v1796_v2 = vld [vmem:[#allocation7 + $0x1fc] ss:$28 sps:$4 sm:$0xff]   ;;  %v1802_v4 = vld [vmem:[#allocation7 + $0x234] ss:$28 sps:$4 sm:$0xff]  }
  0x4b   :  { %1656 = vmatpush3.bf16.msra.mxu0 %v1704_v7  ;;  %1676 = vmatpush3.bf16.msra.mxu1 %v1712_v12  ;;  %v1794_v3 = vld [vmem:[#allocation7 + $0x1f8] ss:$28 sps:$4 sm:$0xff]   ;;  %v1800_v5 = vld [vmem:[#allocation7 + $0x230] ss:$28 sps:$4 sm:$0xff]   ;;  %v1806_v7 = vld [vmem:[#allocation7 + $0x268] ss:$28 sps:$4 sm:$0xff]  }
  0x4c   :  { %1657 = vmatprep.subr.bf16.mxu0 %v2031_v0  ;;  %1677 = vmatprep.subr.bf16.mxu1 %v2031_v0  ;;  %v1808_v6 = vld [vmem:[#allocation7 + $0x26c] ss:$28 sps:$4 sm:$0xff]   ;;  %v1814_v8 = vld [vmem:[#allocation7 + $0x2a4] ss:$28 sps:$4 sm:$0xff]   ;;  %v1820_v10 = vld [vmem:[#allocation7 + $0x2dc] ss:$28 sps:$4 sm:$0xff]  }
  0x4d   :  { %v1454_v12 = vld [vmem:[%s2161_s3 + $0x1] ss:$0 sm:$0xff] }
  0x4f   :  { %1658 = vmatpush3.bf16.msra.mxu0 %v1705_v9  ;;  %1678 = vmatpush3.bf16.msra.mxu1 %v1713_v16  ;;  %v1812_v9 = vld [vmem:[#allocation7 + $0x2a0] ss:$28 sps:$4 sm:$0xff]  }
  0x50   :  { %1659 = vmatprep.subr.bf16.mxu0 %v2031_v0  ;;  %1679 = vmatprep.subr.bf16.mxu1 %v2031_v0 }
  0x53   :  { %1660 = vmatpush3.bf16.msra.mxu0 %v1706_v11  ;;  %1680 = vmatpush3.bf16.msra.mxu1 %v1714_v18  ;;  %v1818_v11 = vld [vmem:[#allocation7 + $0x2d8] ss:$28 sps:$4 sm:$0xff]  }
  0x54   :  { %1661 = vmatprep.subr.bf16.mxu0 %v2031_v0  ;;  %1681 = vmatprep.subr.bf16.mxu1 %v2031_v0  ;;  %v1790_v0 = vld [vmem:[#allocation7 + $0x1c4] ss:$28 sps:$4 sm:$0xff]  }
  0x57   :  { %1662 = vmatpush3.bf16.msra.mxu0 %v1707_v13  ;;  %1682 = vmatpush3.bf16.msra.mxu1 %v1715_v19 }
  0x58   :  { %402 = vmatprep.subr.bf16.mxu0 %v1718_v21  ;;  %1191 = vmatprep.subr.bf16.mxu1 %v1742_v48  ;;  %v1743_v21 = vld [vmem:[#allocation7 + $0x8] ss:$28 sps:$4 sm:$0xff]   ;;  %v1821_v48 = vld [vmem:[#allocation7 + $0x2e0] ss:$28 sps:$4 sm:$0xff]  }
  0x5a   :  { %1664 = vmatmul.mubr.bf16.vlgmr.msra.gmra.mrb[0].mxu0 %v114_v17 }
  0x5b   :  { %403 = vmatpush1.bf16.msra.mxu0 %v1716_v20  ;;  %434 = vmatprep.mubr.bf16.mxu0 %v2033_v46  ;;  %v1815_v46 = vld [vmem:[#allocation7 + $0x2a8] ss:$28 sps:$4 sm:$0xff]  }
  0x5c   :  { %404 = vmatprep.subr.bf16.mxu0 %v1721_v22 }
  0x5f   :  { %405 = vmatpush1.bf16.msra.mxu0 %v1719_v23  ;;  %v1751_v23 = vld [vmem:[#allocation7 + $0x44] ss:$28 sps:$4 sm:$0xff]  }
  0x60   :  { %406 = vmatprep.subr.bf16.mxu0 %v1724_v24  ;;  %v1749_v24 = vld [vmem:[#allocation7 + $0x40] ss:$28 sps:$4 sm:$0xff]  }
  0x63   :  { %407 = vmatpush1.bf16.msra.mxu0 %v1722_v25  ;;  %v1757_v25 = vld [vmem:[#allocation7 + $0x7c] ss:$28 sps:$4 sm:$0xff]  }
  0x64   :  { %408 = vmatprep.subr.bf16.mxu0 %v1727_v26  ;;  %v1755_v26 = vld [vmem:[#allocation7 + $0x78] ss:$28 sps:$4 sm:$0xff]  }
  0x67   :  { %409 = vmatpush1.bf16.msra.mxu0 %v1725_v27  ;;  %v1763_v27 = vld [vmem:[#allocation7 + $0xb4] ss:$28 sps:$4 sm:$0xff]  }
  0x68   :  { %410 = vmatprep.subr.bf16.mxu0 %v1730_v28  ;;  %v1761_v28 = vld [vmem:[#allocation7 + $0xb0] ss:$28 sps:$4 sm:$0xff]  }
  0x6b   :  { %411 = vmatpush1.bf16.msra.mxu0 %v1728_v29  ;;  %v1769_v29 = vld [vmem:[#allocation7 + $0xec] ss:$28 sps:$4 sm:$0xff]  }
  0x6c   :  { %412 = vmatprep.subr.bf16.mxu0 %v1733_v30  ;;  %v1767_v30 = vld [vmem:[#allocation7 + $0xe8] ss:$28 sps:$4 sm:$0xff]  }
  0x6f   :  { %413 = vmatpush1.bf16.msra.mxu0 %v1731_v31  ;;  %v1775_v31 = vld [vmem:[#allocation7 + $0x124] ss:$28 sps:$4 sm:$0xff]  }
  0x70   :  { %414 = vmatprep.subr.bf16.mxu0 %v1736_v42  ;;  %v1803_v42 = vld [vmem:[#allocation7 + $0x238] ss:$28 sps:$4 sm:$0xff]  }
  0x73   :  { %415 = vmatpush1.bf16.msra.mxu0 %v1734_v43  ;;  %v1811_v43 = vld [vmem:[#allocation7 + $0x274] ss:$28 sps:$4 sm:$0xff]  }
  0x74   :  { %416 = vmatprep.subr.bf16.mxu0 %v1739_v44  ;;  %v1809_v44 = vld [vmem:[#allocation7 + $0x270] ss:$28 sps:$4 sm:$0xff]  }
  0x77   :  { %417 = vmatpush1.bf16.msra.mxu0 %v1737_v45  ;;  %v1817_v45 = vld [vmem:[#allocation7 + $0x2ac] ss:$28 sps:$4 sm:$0xff]  }
  0x78   :  { %1234 = vmatprep.subr.bf16.mxu0 %v1745_v49  ;;  %v1826_v49 = vld [vmem:[#allocation7 + $0x314] ss:$28 sps:$4 sm:$0xff]  }
 0x12d   :  { %v203_v33 = vpop.f32.mrb[0].mxu0 }
 0x12e   :  { %v204_v34 = vadd.f32 %v1445_v32, %v203_v33  ;;  %v1665_v35 = vpop.f32.mrb[1].mxu0  ;;  %v1781_v33 = vld [vmem:[#allocation7 + $0x15c] ss:$28 sps:$4 sm:$0xff]  }
 0x12f   :  { %v206_v36 = vpop.f32.mrb[2].mxu0  ;;  %v1787_v35 = vld [vmem:[#allocation7 + $0x194] ss:$28 sps:$4 sm:$0xff]  }
 0x130   :  { %v207_v37 = vadd.f32 %v1445_v32, %v206_v36  ;;  %v1666_v38 = vpop.f32.mrb[3].mxu0  ;;  %v210_v39 = vmax.f32 %v204_v34, 0.0  ;;  %v1773_v32 = vld [vmem:[#allocation7 + $0x120] ss:$28 sps:$4 sm:$0xff]   ;;  %v1779_v34 = vld [vmem:[#allocation7 + $0x158] ss:$28 sps:$4 sm:$0xff]  }
 0x131   :  { %v1785_v36 = vld [vmem:[#allocation7 + $0x190] ss:$28 sps:$4 sm:$0xff]   ;;  %v1791_v38 = vld [vmem:[#allocation7 + $0x1c8] ss:$28 sps:$4 sm:$0xff]  }
 0x132   :  { %v211_v40 = vmax.f32 %v207_v37, 0.0  ;;  %v1793_v37 = vld [vmem:[#allocation7 + $0x1cc] ss:$28 sps:$4 sm:$0xff]  }
 0x134   :  { %v212_v41 = vpack.c.bf16 %v211_v40, %v210_v39  ;;  %v1799_v39 = vld [vmem:[#allocation7 + $0x204] ss:$28 sps:$4 sm:$0xff]  }
 0x135   :  { %v1797_v40 = vld [vmem:[#allocation7 + $0x200] ss:$28 sps:$4 sm:$0xff]  }
 0x136   :  { %1684 = vmatmul.mubr.bf16.vlgmr.msra.gmra.mrb[0].mxu1 %v212_v41  ;;  %v1805_v41 = vld [vmem:[#allocation7 + $0x23c] ss:$28 sps:$4 sm:$0xff]  }
 0x137   :  { %1192 = vmatpush1.bf16.msra.mxu1 %v1740_v47  ;;  %v1823_v47 = vld [vmem:[#allocation7 + $0x2e4] ss:$28 sps:$4 sm:$0xff]  }
 0x138   :  { %1193 = vmatprep.subr.bf16.mxu1 %v1748_v50  ;;  %v1829_v50 = vld [vmem:[#allocation7 + $0x31c] ss:$28 sps:$4 sm:$0xff]  }
 0x13b   :  { %1194 = vmatpush1.bf16.msra.mxu1 %v1746_v51  ;;  %v1824_v51 = vld [vmem:[#allocation7 + $0x310] ss:$28 sps:$4 sm:$0xff]  }
 0x13c   :  { %1195 = vmatprep.subr.bf16.mxu1 %v1754_v52  ;;  %v1827_v52 = vld [vmem:[#allocation7 + $0x318] ss:$28 sps:$4 sm:$0xff]  }
 0x13f   :  { %1196 = vmatpush1.bf16.msra.mxu1 %v1752_v53  ;;  %v1832_v53 = vld [vmem:[#allocation7 + $0x34c] ss:$28 sps:$4 sm:$0xff]  }
 0x140   :  { %1197 = vmatprep.subr.bf16.mxu1 %v1760_v54  ;;  %v1835_v54 = vld [vmem:[#allocation7 + $0x354] ss:$28 sps:$4 sm:$0xff]  }
 0x143   :  { %1198 = vmatpush1.bf16.msra.mxu1 %v1758_v55  ;;  %v1830_v55 = vld [vmem:[#allocation7 + $0x348] ss:$28 sps:$4 sm:$0xff]  }
 0x144   :  { %1199 = vmatprep.subr.bf16.mxu1 %v1766_v56  ;;  %v1833_v56 = vld [vmem:[#allocation7 + $0x350] ss:$28 sps:$4 sm:$0xff]  }
 0x147   :  { %1200 = vmatpush1.bf16.msra.mxu1 %v1764_v57  ;;  %v1838_v57 = vld [vmem:[#allocation7 + $0x14] ss:$28 sps:$4 sm:$0xff]  }
 0x148   :  { %1201 = vmatprep.subr.bf16.mxu1 %v1772_v58  ;;  %v1839_v58 = vld [vmem:[#allocation7 + $0x1d8] ss:$28 sps:$4 sm:$0xff]  }
 0x14b   :  { %1202 = vmatpush1.bf16.msra.mxu1 %v1770_v59  ;;  %v312_v59 = vlaneseq }
 0x14c   :  { %1203 = vmatprep.subr.bf16.mxu1 %v1778_v60 }
 0x14d   :  { %v2105_v60 = vshrl.u32 %v312_v59, 7  ;;  %v1894_v59 = vld [vmem:[#allocation7 + $0x320] ss:$28 sps:$4 sm:$0xff]  }
 0x14f   :  { %1204 = vmatpush1.bf16.msra.mxu1 %v1776_v61  ;;  %v314_v61 = vsub.s32 0, %v2105_v60 }
 0x150   :  { %1205 = vmatprep.subr.bf16.mxu1 %v1784_v62  ;;  %v110_v62 = vld [vmem:[%s2161_s3 + $0x2] sm:$0x3] }
 0x153   :  { %1206 = vmatpush1.bf16.msra.mxu1 %v1782_v63  ;;  %v318_v63 = vsub.s32 1, %v2105_v60 }
 0x154   :  { %1207 = vmatprep.subr.bf16.mxu1 %v1790_v0  ;;  %v315_v0 = vrot.slane %v110_v62, %v314_v61 }
 0x157   :  { %1208 = vmatpush1.bf16.msra.mxu1 %v1788_v1  ;;  %v319_v1 = vrot.slane %v110_v62, %v318_v63  ;;  %v1899_v62 = vld [vmem:[#allocation7 + $0x35c] ss:$28 sps:$4 sm:$0xff]  }
 0x158   :  { %1209 = vmatprep.subr.bf16.mxu1 %v1796_v2 }
 0x15b   :  { %1210 = vmatpush1.bf16.msra.mxu1 %v1794_v3 }
 0x15c   :  { %1211 = vmatprep.subr.bf16.mxu1 %v1802_v4 }
 0x15f   :  { %1212 = vmatpush1.bf16.msra.mxu1 %v1800_v5 }
 0x160   :  { %1213 = vmatprep.subr.bf16.mxu1 %v1808_v6 }
 0x163   :  { %1214 = vmatpush1.bf16.msra.mxu1 %v1806_v7 }
 0x164   :  { %1215 = vmatprep.subr.bf16.mxu1 %v1814_v8 }
 0x167   :  { %1216 = vmatpush1.bf16.msra.mxu1 %v1812_v9 }
 0x168   :  { %1217 = vmatprep.subr.bf16.mxu1 %v1820_v10 }
 0x16b   :  { %1218 = vmatpush1.bf16.msra.mxu1 %v1818_v11 }
 0x16c   :  { %1219 = vmatprep.subr.bf16.mxu1 %v1826_v49  ;;  %v1879_v49 = vld [vmem:[#allocation7 + $0x208] ss:$28 sps:$4 sm:$0xff]  }
 0x16f   :  { %1220 = vmatpush1.bf16.msra.mxu1 %v1824_v51  ;;  %v1882_v51 = vld [vmem:[#allocation7 + $0x240] ss:$28 sps:$4 sm:$0xff]  }
 0x170   :  { %1221 = vmatprep.subr.bf16.mxu1 %v1832_v53  ;;  %v1885_v53 = vld [vmem:[#allocation7 + $0x278] ss:$28 sps:$4 sm:$0xff]  }
 0x173   :  { %1222 = vmatpush1.bf16.msra.mxu1 %v1830_v55  ;;  %v1888_v55 = vld [vmem:[#allocation7 + $0x2b0] ss:$28 sps:$4 sm:$0xff]  }
 0x174   :  { %1277 = vmatprep.subr.bf16.mxu1 %v1838_v57  ;;  %v1891_v57 = vld [vmem:[#allocation7 + $0x2e8] ss:$28 sps:$4 sm:$0xff]  }
 0x209   :  { %v301_v13 = vpop.f32.mrb[0].mxu1 }
 0x20a   :  { %v302_v14 = vadd.f32 %v1454_v12, %v301_v13  ;;  %v1685_v15 = vpop.f32.mrb[1].mxu1 }
 0x20b   :  { %v304_v16 = vpop.f32.mrb[2].mxu1 }
 0x20c   :  { %v305_v17 = vadd.f32 %v1454_v12, %v304_v16  ;;  %v1686_v18 = vpop.f32.mrb[3].mxu1  ;;  %v308_v19 = vmax.f32 %v302_v14, 0.0  ;;  %v1836_v16 = vld [vmem:[#allocation7 + $0x10] ss:$28 sps:$4 sm:$0xff]  }
 0x20d   :  { %v1843_v18 = vld [vmem:[#allocation7 + $0x4c] ss:$28 sps:$4 sm:$0xff]  }
 0x20e   :  { %v309_v20 = vmax.f32 %v305_v17, 0.0  ;;  %v1840_v17 = vld [vmem:[#allocation7 + $0x18] ss:$28 sps:$4 sm:$0xff]  }
 0x210   :  { %v310_v22 = vpack.c.bf16 %v309_v20, %v308_v19  ;;  %v1844_v19 = vld [vmem:[#allocation7 + $0x210] ss:$28 sps:$4 sm:$0xff]   ;;  %v1841_v20 = vld [vmem:[#allocation7 + $0x48] ss:$28 sps:$4 sm:$0xff]  }
 0x212   :  { %435 = vmatmul.mubr.bf16.vlgmr.msra.gmra.mrb[4].mxu0 %v310_v22  ;;  %v1848_v22 = vld [vmem:[#allocation7 + $0x84] ss:$28 sps:$4 sm:$0xff]  }
 0x213   :  { %1235 = vmatpush1.bf16.msra.mxu0 %v1743_v21  ;;  %v1845_v21 = vld [vmem:[#allocation7 + $0x50] ss:$28 sps:$4 sm:$0xff]  }
 0x214   :  { %1236 = vmatprep.subr.bf16.mxu0 %v1751_v23  ;;  %v1849_v23 = vld [vmem:[#allocation7 + $0x248] ss:$28 sps:$4 sm:$0xff]  }
 0x217   :  { %1237 = vmatpush1.bf16.msra.mxu0 %v1749_v24  ;;  %v1846_v24 = vld [vmem:[#allocation7 + $0x80] ss:$28 sps:$4 sm:$0xff]  }
 0x218   :  { %1238 = vmatprep.subr.bf16.mxu0 %v1757_v25  ;;  %v1850_v25 = vld [vmem:[#allocation7 + $0x88] ss:$28 sps:$4 sm:$0xff]  }
 0x21b   :  { %1239 = vmatpush1.bf16.msra.mxu0 %v1755_v26  ;;  %v1853_v26 = vld [vmem:[#allocation7 + $0xbc] ss:$28 sps:$4 sm:$0xff]  }
 0x21c   :  { %1240 = vmatprep.subr.bf16.mxu0 %v1763_v27  ;;  %v1854_v27 = vld [vmem:[#allocation7 + $0x280] ss:$28 sps:$4 sm:$0xff]  }
 0x21f   :  { %1241 = vmatpush1.bf16.msra.mxu0 %v1761_v28  ;;  %v1851_v28 = vld [vmem:[#allocation7 + $0xb8] ss:$28 sps:$4 sm:$0xff]  }
 0x220   :  { %1242 = vmatprep.subr.bf16.mxu0 %v1769_v29  ;;  %v1855_v29 = vld [vmem:[#allocation7 + $0xc0] ss:$28 sps:$4 sm:$0xff]  }
 0x223   :  { %1243 = vmatpush1.bf16.msra.mxu0 %v1767_v30  ;;  %v1858_v30 = vld [vmem:[#allocation7 + $0xf4] ss:$28 sps:$4 sm:$0xff]  }
 0x224   :  { %1244 = vmatprep.subr.bf16.mxu0 %v1775_v31  ;;  %v1859_v31 = vld [vmem:[#allocation7 + $0x2b8] ss:$28 sps:$4 sm:$0xff]  }
 0x227   :  { %1245 = vmatpush1.bf16.msra.mxu0 %v1773_v32  ;;  %v1856_v32 = vld [vmem:[#allocation7 + $0xf0] ss:$28 sps:$4 sm:$0xff]  }
 0x228   :  { %1246 = vmatprep.subr.bf16.mxu0 %v1781_v33  ;;  %v1860_v33 = vld [vmem:[#allocation7 + $0xf8] ss:$28 sps:$4 sm:$0xff]  }
 0x22b   :  { %1247 = vmatpush1.bf16.msra.mxu0 %v1779_v34  ;;  %v1863_v34 = vld [vmem:[#allocation7 + $0x12c] ss:$28 sps:$4 sm:$0xff]  }
 0x22c   :  { %1248 = vmatprep.subr.bf16.mxu0 %v1787_v35  ;;  %v1864_v35 = vld [vmem:[#allocation7 + $0x2f0] ss:$28 sps:$4 sm:$0xff]  }
 0x22f   :  { %1249 = vmatpush1.bf16.msra.mxu0 %v1785_v36  ;;  %v1861_v36 = vld [vmem:[#allocation7 + $0x128] ss:$28 sps:$4 sm:$0xff]  }
 0x230   :  { %1250 = vmatprep.subr.bf16.mxu0 %v1793_v37  ;;  %v1865_v37 = vld [vmem:[#allocation7 + $0x130] ss:$28 sps:$4 sm:$0xff]  }
 0x233   :  { %1251 = vmatpush1.bf16.msra.mxu0 %v1791_v38  ;;  %v1868_v38 = vld [vmem:[#allocation7 + $0x164] ss:$28 sps:$4 sm:$0xff]  }
 0x234   :  { %1252 = vmatprep.subr.bf16.mxu0 %v1799_v39  ;;  %v1869_v39 = vld [vmem:[#allocation7 + $0x328] ss:$28 sps:$4 sm:$0xff]  }
 0x237   :  { %1253 = vmatpush1.bf16.msra.mxu0 %v1797_v40  ;;  %v1866_v40 = vld [vmem:[#allocation7 + $0x160] ss:$28 sps:$4 sm:$0xff]  }
 0x238   :  { %1254 = vmatprep.subr.bf16.mxu0 %v1805_v41  ;;  %v1870_v41 = vld [vmem:[#allocation7 + $0x168] ss:$28 sps:$4 sm:$0xff]  }
 0x23b   :  { %1255 = vmatpush1.bf16.msra.mxu0 %v1803_v42  ;;  %v1873_v42 = vld [vmem:[#allocation7 + $0x19c] ss:$28 sps:$4 sm:$0xff]  }
 0x23c   :  { %1256 = vmatprep.subr.bf16.mxu0 %v1811_v43  ;;  %v1874_v43 = vld [vmem:[#allocation7 + $0x360] ss:$28 sps:$4 sm:$0xff]  }
 0x23f   :  { %1257 = vmatpush1.bf16.msra.mxu0 %v1809_v44  ;;  %v1871_v44 = vld [vmem:[#allocation7 + $0x198] ss:$28 sps:$4 sm:$0xff]  }
 0x240   :  { %1258 = vmatprep.subr.bf16.mxu0 %v1817_v45  ;;  %v1875_v45 = vld [vmem:[#allocation7 + $0x1a0] ss:$28 sps:$4 sm:$0xff]  }
 0x243   :  { %1259 = vmatpush1.bf16.msra.mxu0 %v1815_v46  ;;  %v1878_v46 = vld [vmem:[#allocation7 + $0x1d4] ss:$28 sps:$4 sm:$0xff]  }
 0x244   :  { %1260 = vmatprep.subr.bf16.mxu0 %v1823_v47  ;;  %v1876_v47 = vld [vmem:[#allocation7 + $0x1d0] ss:$28 sps:$4 sm:$0xff]  }
 0x247   :  { %1261 = vmatpush1.bf16.msra.mxu0 %v1821_v48  ;;  %v1881_v48 = vld [vmem:[#allocation7 + $0x20c] ss:$28 sps:$4 sm:$0xff]  }
 0x248   :  { %1262 = vmatprep.subr.bf16.mxu0 %v1829_v50  ;;  %v1884_v50 = vld [vmem:[#allocation7 + $0x244] ss:$28 sps:$4 sm:$0xff]  }
 0x24b   :  { %1263 = vmatpush1.bf16.msra.mxu0 %v1827_v52  ;;  %v1887_v52 = vld [vmem:[#allocation7 + $0x27c] ss:$28 sps:$4 sm:$0xff]  }
 0x24c   :  { %1264 = vmatprep.subr.bf16.mxu0 %v1835_v54  ;;  %v1890_v54 = vld [vmem:[#allocation7 + $0x2b4] ss:$28 sps:$4 sm:$0xff]  }
 0x24f   :  { %1265 = vmatpush1.bf16.msra.mxu0 %v1833_v56  ;;  %v1893_v56 = vld [vmem:[#allocation7 + $0x2ec] ss:$28 sps:$4 sm:$0xff]  }
 0x250   :  { %1625 = vmatprep.subr.bf16.mxu0 %v1839_v58  ;;  %v1896_v58 = vld [vmem:[#allocation7 + $0x324] ss:$28 sps:$4 sm:$0xff]  }
 0x2e5   :  { %v436_v2 = vpop.f32.mrb[4].mxu0 }
 0x2e6   :  { %v437_v3 = vadd.f32 %v436_v2, %v315_v0  ;;  %v438_v4 = vpop.f32.mrb[5].mxu0  ;;  %v2126_v2 = vld [vmem:[%s2161_s3 + $0x4] sm:$0xff]  ;;  %s2034_s3 = smov [#allocation8]  }
 0x2e7   :  { %v439_v5 = vadd.f32 %v438_v4, %v319_v1  ;;  %v440_v6 = vpop.f32.mrb[6].mxu0  ;;  %v583_v4 = vrot.slane %v2126_v2, %v314_v61  ;;  %s1432_s10 = sshll.u32 %s2034_s3, 4  ;;  %s1433_s10 = int_to_ptr.vmem [resolvable:$true] %s1432_s10 }
 0x2e8   :  { %v441_v7 = vadd.f32 %v440_v6, %v315_v0  ;;  %v442_v8 = vpop.f32.mrb[7].mxu0  ;;  %v445_v10 = vmax.f32 %v437_v3, 0.0  ;;  %v1897_v0 = vld [vmem:[#allocation7 + $0x358] ss:$28 sps:$4 sm:$0xff]   ;;  %v594_v3 = vsub.s32 3, %v2105_v60  ;;  %v587_v6 = vrot.slane %v2126_v2, %v318_v63  ;;  %s1994_s11 = scalar_lea.vmem %s1433_s10, 896  ;;  %p1999_p11 = scmp.lt.s32.totalorder %s1433_s10, %s1433_s10 }
 0x2e9   :  { %v443_v9 = vadd.f32 %v442_v8, %v319_v1  ;;  %v446_v12 = vmax.f32 %v439_v5, 0.0  ;;  %v590_v1 = vsub.s32 2, %v2105_v60  ;;  %p1995_p10 = scmp.ne.s32.totalorder %s1433_s10, %s1994_s11  ;;  %p2000_p12 = scmp.lt.s32.totalorder %s1994_s11, %s1994_s11 }
 0x2ea   :  { %v447_v11 = vmax.f32 %v441_v7, 0.0  ;;  %v595_v7 = vrot.slane %v2126_v2, %v594_v3 }
 0x2eb   :  { %v448_v13 = vmax.f32 %v443_v9, 0.0  ;;  %v591_v5 = vrot.slane %v2126_v2, %v590_v1  ;;  %p2001_p13 = por %p2000_p12, %p1999_p11 }
 0x2ec   :  { %v2116_v14 = vpack.c.bf16 %v447_v11, %v445_v10 }
 0x2ed   :  { %v450_v15 = vpack.c.bf16 %v448_v13, %v446_v12  ;;  %p2002_p0 = pnand %p2001_p13, %p1995_p10 }
 0x2ef   :  { %1223 = vmatprep.mubr.bf16.mxu1 %v450_v15  ;;  %1266 = vmatprep.mubr.bf16.mxu0 %v450_v15 }
 0x2f0   :  { %1224 = vmatmul.mubr.bf16.vlgmr.msra.gmra.mrb[4].mxu1 %v2116_v14  ;;  %1267 = vmatmul.mubr.bf16.vlgmr.msra.gmra.mrb[8].mxu0 %v2116_v14 }
 0x2f1   :  { %1278 = vmatpush1.bf16.msra.mxu1 %v1836_v16  ;;  %1626 = vmatpush3.bf16.msra.mxu0 %v1840_v17 }
 0x2f2   :  { %1309 = vmatprep.mubr.bf16.mxu1 %v450_v15  ;;  %1352 = vmatprep.mubr.bf16.mxu0 %v450_v15 }
 0x2f3   :  { %1279 = vmatprep.subr.bf16.mxu1 %v1843_v18  ;;  %1627 = vmatprep.subr.bf16.mxu0 %v1844_v19 }
 0x2f5   :  { %1280 = vmatpush1.bf16.msra.mxu1 %v1841_v20  ;;  %1628 = vmatpush3.bf16.msra.mxu0 %v1845_v21 }
 0x2f6   :  { %1281 = vmatprep.subr.bf16.mxu1 %v1848_v22  ;;  %1629 = vmatprep.subr.bf16.mxu0 %v1849_v23 }
 0x2f9   :  { %1282 = vmatpush1.bf16.msra.mxu1 %v1846_v24  ;;  %1630 = vmatpush3.bf16.msra.mxu0 %v1850_v25 }
 0x2fa   :  { %1283 = vmatprep.subr.bf16.mxu1 %v1853_v26  ;;  %1631 = vmatprep.subr.bf16.mxu0 %v1854_v27 }
 0x2fd   :  { %1284 = vmatpush1.bf16.msra.mxu1 %v1851_v28  ;;  %1632 = vmatpush3.bf16.msra.mxu0 %v1855_v29 }
 0x2fe   :  { %1285 = vmatprep.subr.bf16.mxu1 %v1858_v30  ;;  %1633 = vmatprep.subr.bf16.mxu0 %v1859_v31 }
 0x301   :  { %1286 = vmatpush1.bf16.msra.mxu1 %v1856_v32  ;;  %1634 = vmatpush3.bf16.msra.mxu0 %v1860_v33 }
 0x302   :  { %1287 = vmatprep.subr.bf16.mxu1 %v1863_v34  ;;  %1635 = vmatprep.subr.bf16.mxu0 %v1864_v35  ;;  %v606_v34 = vsub.s32 6, %v2105_v60 }
 0x305   :  { %1288 = vmatpush1.bf16.msra.mxu1 %v1861_v36  ;;  %1636 = vmatpush3.bf16.msra.mxu0 %v1865_v37  ;;  %v607_v36 = vrot.slane %v2126_v2, %v606_v34 }
 0x306   :  { %1289 = vmatprep.subr.bf16.mxu1 %v1868_v38  ;;  %1637 = vmatprep.subr.bf16.mxu0 %v1869_v39 }
 0x309   :  { %1290 = vmatpush1.bf16.msra.mxu1 %v1866_v40  ;;  %1638 = vmatpush3.bf16.msra.mxu0 %v1870_v41 }
 0x30a   :  { %1291 = vmatprep.subr.bf16.mxu1 %v1873_v42  ;;  %1639 = vmatprep.subr.bf16.mxu0 %v1874_v43 }
 0x30d   :  { %1292 = vmatpush1.bf16.msra.mxu1 %v1871_v44  ;;  %1640 = vmatpush3.bf16.msra.mxu0 %v1875_v45 }
 0x30e   :  { %1293 = vmatprep.subr.bf16.mxu1 %v1878_v46 }
 0x310   :  { %1353 = vmatmul.mubr.bf16.vlgmr.msra.gmra.mrb[12].mxu0 %v2116_v14 }
 0x311   :  { %1294 = vmatpush1.bf16.msra.mxu1 %v1876_v47 }
 0x312   :  { %1295 = vmatprep.subr.bf16.mxu1 %v1881_v48  ;;  %v598_v48 = vsub.s32 4, %v2105_v60 }
 0x315   :  { %1296 = vmatpush1.bf16.msra.mxu1 %v1879_v49  ;;  %v602_v49 = vsub.s32 5, %v2105_v60 }
 0x316   :  { %1297 = vmatprep.subr.bf16.mxu1 %v1884_v50  ;;  %v599_v50 = vrot.slane %v2126_v2, %v598_v48 }
 0x319   :  { %1298 = vmatpush1.bf16.msra.mxu1 %v1882_v51  ;;  %v603_v51 = vrot.slane %v2126_v2, %v602_v49 }
 0x31a   :  { %1299 = vmatprep.subr.bf16.mxu1 %v1887_v52 }
 0x31d   :  { %1300 = vmatpush1.bf16.msra.mxu1 %v1885_v53 }
 0x31e   :  { %1301 = vmatprep.subr.bf16.mxu1 %v1890_v54 }
 0x321   :  { %1302 = vmatpush1.bf16.msra.mxu1 %v1888_v55 }
 0x322   :  { %1303 = vmatprep.subr.bf16.mxu1 %v1893_v56 }
 0x325   :  { %1304 = vmatpush1.bf16.msra.mxu1 %v1891_v57 }
 0x326   :  { %1305 = vmatprep.subr.bf16.mxu1 %v1896_v58 }
 0x329   :  { %1306 = vmatpush1.bf16.msra.mxu1 %v1894_v59 }
 0x32a   :  { %1307 = vmatprep.subr.bf16.mxu1 %v1899_v62 }
 0x32d   :  { %1308 = vmatpush1.bf16.msra.mxu1 %v1897_v0 }
 0x330   :  { %1310 = vmatmul.mubr.bf16.vlgmr.msra.gmra.mrb[8].mxu1 %v2116_v14 }
 0x3c3   :  { %v1225_v8 = vpop.f32.mrb[4].mxu1  ;;  %v1268_v9 = vpop.f32.mrb[8].mxu0 }
 0x3c4   :  { %v1226_v10 = vadd.f32 %v1225_v8, %v583_v4  ;;  %v1269_v11 = vadd.f32 %v1268_v9, %v591_v5  ;;  %v1227_v12 = vpop.f32.mrb[5].mxu1  ;;  %v1270_v13 = vpop.f32.mrb[9].mxu0 }
 0x3c5   :  { %v1228_v14 = vadd.f32 %v1227_v12, %v587_v6  ;;  %v1271_v15 = vadd.f32 %v1270_v13, %v595_v7  ;;  %v1229_v16 = vpop.f32.mrb[6].mxu1  ;;  %v1272_v17 = vpop.f32.mrb[10].mxu0 }
 0x3c6   :  { %1900 = vtanh.f32 %v1226_v10  ;;  %v1230_v61 = vadd.f32 %v1229_v16, %v583_v4  ;;  %v1231_v18 = vpop.f32.mrb[7].mxu1  ;;  %v1274_v19 = vpop.f32.mrb[11].mxu0  ;;  %v1273_v20 = vadd.f32 %v1272_v17, %v591_v5 }
 0x3c7   :  { %1902 = vtanh.f32 %v1269_v11  ;;  %v1232_v63 = vadd.f32 %v1231_v18, %v587_v6  ;;  %v1275_v21 = vadd.f32 %v1274_v19, %v595_v7 }
 0x3c8   :  { %1904 = vtanh.f32 %v1228_v14 }
 0x3c9   :  { %1906 = vtanh.f32 %v1271_v15 }
 0x3ca   :  { %1908 = vtanh.f32 %v1230_v61 }
 0x3cb   :  { %1910 = vtanh.f32 %v1273_v20 }
 0x3cc   :  { %1912 = vtanh.f32 %v1232_v63 }
 0x3cd   :  { %1914 = vtanh.f32 %v1275_v21 }
 0x3d0   :  { %v1901_v22 = vpop.eup %1900 }
 0x3d1   :  { %v1903_v23 = vpop.eup %1902 }
 0x3d2   :  { %v1905_v24 = vpop.eup %1904 }
 0x3d3   :  { %v1907_v25 = vpop.eup %1906  ;;  %v1599_v26 = vpack.c.bf16 %v1905_v24, %v1901_v22 }
 0x3d4   :  { %v1909_v27 = vpop.eup %1908  ;;  %v1600_v28 = vpack.c.bf16 %v1907_v25, %v1903_v23 }
 0x3d5   :  { %v1911_v29 = vpop.eup %1910  ;;  %1419 = vst [vmem:[#allocation8] sm:$0xff] %v1599_v26 }
 0x3d6   :  { %v1913_v30 = vpop.eup %1912  ;;  %1420 = vst [vmem:[#allocation8 + $0x8] sm:$0xff] %v1600_v28 }
 0x3d7   :  { %v1915_v31 = vpop.eup %1914  ;;  %v1603_v32 = vpack.c.bf16 %v1913_v30, %v1909_v27 }
 0x3d8   :  { %v1604_v33 = vpack.c.bf16 %v1915_v31, %v1911_v29 }
 0x3d9   :  { %1423 = vst [vmem:[#allocation8 + $0x1c] sm:$0xff] %v1603_v32 }
 0x3da   :  { %1424 = vst [vmem:[#allocation8 + $0x24] sm:$0xff] %v1604_v33 }
 0x3e3   :  { %v1641_v35 = vpop.f32.mrb[12].mxu0 }
 0x3e4   :  { %v1642_v37 = vpop.f32.mrb[13].mxu0 }
 0x3e5   :  { %v1643_v38 = vadd.f32 %v1642_v37, %v1641_v35  ;;  %v1644_v39 = vpop.f32.mrb[14].mxu0 }
 0x3e6   :  { %v1645_v40 = vpop.f32.mrb[15].mxu0 }
 0x3e7   :  { %v1355_v41 = vadd.f32 %v1643_v38, %v607_v36  ;;  %v1646_v42 = vadd.f32 %v1645_v40, %v1644_v39 }
 0x3e9   :  { %1916 = vtanh.f32 %v1355_v41  ;;  %v1358_v43 = vadd.f32 %v1646_v42, %v607_v36 }
 0x3eb   :  { %1918 = vtanh.f32 %v1358_v43 }
 0x3f3   :  { %v1917_v44 = vpop.eup %1916 }
 0x3f4   :  { %v1602_v45 = vpack.c.bf16 %v1917_v44, %v1917_v44 }
 0x3f5   :  { %v1919_v46 = vpop.eup %1918 }
 0x3f6   :  { %1422 = vst [vmem:[#allocation8 + $0x18] sm:$0xf] %v1602_v45  ;;  %v1606_v47 = vpack.c.bf16 %v1919_v46, %v1919_v46 }
 0x3f8   :  { %1426 = vst [vmem:[#allocation8 + $0x34] sm:$0xf] %v1606_v47 }
 0x403   :  { %v1311_v52 = vpop.f32.mrb[8].mxu1 }
 0x404   :  { %v1312_v53 = vadd.f32 %v1311_v52, %v599_v50  ;;  %v1313_v54 = vpop.f32.mrb[9].mxu1 }
 0x405   :  { %v1314_v55 = vadd.f32 %v1313_v54, %v603_v51  ;;  %v1315_v56 = vpop.f32.mrb[10].mxu1 }
 0x406   :  { %1920 = vtanh.f32 %v1312_v53  ;;  %v1316_v57 = vadd.f32 %v1315_v56, %v599_v50  ;;  %v1317_v58 = vpop.f32.mrb[11].mxu1 }
 0x407   :  { %1922 = vtanh.f32 %v1314_v55  ;;  %v1318_v59 = vadd.f32 %v1317_v58, %v603_v51 }
 0x408   :  { %1924 = vtanh.f32 %v1316_v57 }
 0x409   :  { %1926 = vtanh.f32 %v1318_v59 }
 0x410   :  { %v1921_v62 = vpop.eup %1920 }
 0x411   :  { %v1923_v0 = vpop.eup %1922 }
 0x412   :  { %v1925_v60 = vpop.eup %1924  ;;  %v1601_v1 = vpack.c.bf16 %v1923_v0, %v1921_v62 }
 0x413   :  { %v1927_v3 = vpop.eup %1926 }
 0x414   :  { %1421 = vst [vmem:[#allocation8 + $0x10] sm:$0xff] %v1601_v1  ;;  %v1605_v2 = vpack.c.bf16 %v1927_v3, %v1925_v60 }
 0x416   :  { %1425 = vst [vmem:[#allocation8 + $0x2c] sm:$0xff] %v1605_v2 }
 0x417   :  { %2005 = shalt.err (!%p2002_p0)
}
 0x418   :  { %s2006_s13 = scalar_lea.hbm %s2162_s4, 896 }
 0x419   :  { %p2007_p1 = scmp.ne.s32.totalorder %s2162_s4, %s2006_s13  ;;  %p2010_p2 = scmp.lt.u32.totalorder %s2006_s13, %s2162_s4 }
 0x41b   :  { %p2012_p3 = pnand %p2010_p2, %p2007_p1 }
 0x41d   :  { %2015 = shalt.err (!%p2012_p3)
}
 0x41e   :  { %1438 = dma.vmem_to_hbm [thread:$0]  %s1433_s10, 896, %s2162_s4, [#allocation4], %s2029_s0, %s2029_s0, %s2030_s26  }
 0x41f   :  { %2020 = dma.done.wait [#allocation4], 896  }
 0x420   :  { %2021 = vsyncadd [#allocation4], 4294966400 }
 0x421   :  { %1442 = vsyncpa [#allocation3], 1 }
 0x422   :  { %1443 = vsyncpa [#allocation6], 1 }
 0x423   :  { %1444 = vsyncpa [#allocation4], 1 }

// kernel: tpu_custom_call.1
= control target key start
LH: loop header
LB: loop body
LE: loop exit
PB: predicated region body
PF: predicated region fallthrough
CT: control target
= control target key end

     0   :  { %9 = vsyncpa [#allocation3], 0  ;;  %s2158_s0 = inlined_call_operand.hbm [shape: f32[16,128], index: 0, kind: input, shape index: {}]   ;;  %s2159_s1 = inlined_call_operand.hbm [shape: bf16[128,512], index: 1, kind: input, shape index: {}]   ;;  %s2160_s2 = inlined_call_operand.hbm [shape: bf16[256,896], index: 2, kind: input, shape index: {}]   ;;  %s2161_s3 = inlined_call_operand.vmem [shape: f32[1,1408], index: 3, kind: input, shape index: {}]   ;;  %s2162_s4 = inlined_call_operand.hbm [shape: bf16[16,896], index: 4, kind: output, shape index: {}]  }
   0x1   :  { %10 = vsyncpa [#allocation6], 0 }
   0x2   :  { %11 = vsyncpa [#allocation4], 0  ;;  %s2022_s15 = smov [#allocation5]   ;;  %s1928_s19 = scalar_lea.hbm %s2159_s1, 4096 }
   0x3   :  { %s29_s16 = sshll.u32 %s2022_s15, 4  ;;  %p1929_p0 = scmp.ne.s32.totalorder %s2159_s1, %s1928_s19  ;;  %s30_s16 = int_to_ptr.vmem [resolvable:$true] %s29_s16 }
   0x4   :  { %p1932_p1 = scmp.lt.u32.totalorder %s1928_s19, %s2159_s1 }
   0x6   :  { %p1934_p2 = pnand %p1932_p1, %p1929_p0 }
   0x8   :  { %1937 = shalt.err (!%p1934_p2)
}
   0x9   :  { %s1938_s24 = scalar_lea.vmem %s30_s16, 4096  ;;  %p1943_p4 = scmp.lt.s32.totalorder %s30_s16, %s30_s16 }
   0xa   :  { %p1939_p3 = scmp.ne.s32.totalorder %s30_s16, %s1938_s24  ;;  %p1944_p5 = scmp.lt.s32.totalorder %s1938_s24, %s1938_s24 }
   0xc   :  { %p1945_p6 = por %p1944_p5, %p1943_p4 }
   0xe   :  { %p1946_p7 = pnand %p1945_p6, %p1939_p3 }
  0x10   :  { %1949 = shalt.err (!%p1946_p7)
}
  0x11   :  { %s2023_s25 = smov 256   ;;  %s2024_s26 = smov 16  }
  0x12   :  { %35 = dma.hbm_to_vmem [thread:$0]  %s2159_s1, 4096, %s30_s16, [#allocation6], %s2023_s25, %s2023_s25, %s2024_s26  }
  0x13   :  { %s2025_s29 = smov [#allocation2]   ;;  %s1950_s7 = scalar_lea.hbm %s2158_s0, 256 }
  0x14   :  { %s17_s30 = sshll.u32 %s2025_s29, 4  ;;  %p1951_p8 = scmp.ne.s32.totalorder %s2158_s0, %s1950_s7  ;;  %s18_s30 = int_to_ptr.vmem [resolvable:$true] %s17_s30 }
  0x15   :  { %p1954_p9 = scmp.lt.u32.totalorder %s1950_s7, %s2158_s0 }
  0x17   :  { %p1956_p10 = pnand %p1954_p9, %p1951_p8 }
  0x19   :  { %1959 = shalt.err (!%p1956_p10)
}
  0x1a   :  { %s1960_s12 = scalar_lea.vmem %s18_s30, 256  ;;  %p1965_p12 = scmp.lt.s32.totalorder %s18_s30, %s18_s30 }
  0x1b   :  { %p1961_p11 = scmp.ne.s32.totalorder %s18_s30, %s1960_s12  ;;  %p1966_p13 = scmp.lt.s32.totalorder %s1960_s12, %s1960_s12 }
  0x1d   :  { %p1967_p0 = por %p1966_p13, %p1965_p12 }
  0x1f   :  { %p1968_p1 = pnand %p1967_p0, %p1961_p11 }
  0x21   :  { %1971 = shalt.err (!%p1968_p1)
}
  0x22   :  { %s2026_s1 = smov 128   ;;  %s2027_s13 = smov 8  }
  0x23   :  { %23 = dma.hbm_to_vmem [thread:$0]  %s2158_s0, 256, %s18_s30, [#allocation3], %s2026_s1, %s2026_s1, %s2027_s13  }
  0x24   :  { %s2028_s16 = smov [#allocation7]   ;;  %s1972_s20 = scalar_lea.hbm %s2160_s2, 14336 }
  0x25   :  { %s41_s17 = sshll.u32 %s2028_s16, 4  ;;  %p1973_p2 = scmp.ne.s32.totalorder %s2160_s2, %s1972_s20  ;;  %s42_s17 = int_to_ptr.vmem [resolvable:$true] %s41_s17 }
  0x26   :  { %p1976_p3 = scmp.lt.u32.totalorder %s1972_s20, %s2160_s2 }
  0x28   :  { %p1978_p4 = pnand %p1976_p3, %p1973_p2 }
  0x2a   :  { %1981 = shalt.err (!%p1978_p4)
}
  0x2b   :  { %s1982_s25 = scalar_lea.vmem %s42_s17, 14336  ;;  %p1987_p6 = scmp.lt.s32.totalorder %s42_s17, %s42_s17 }
  0x2c   :  { %p1983_p5 = scmp.ne.s32.totalorder %s42_s17, %s1982_s25  ;;  %p1988_p7 = scmp.lt.s32.totalorder %s1982_s25, %s1982_s25 }
  0x2e   :  { %p1989_p8 = por %p1988_p7, %p1987_p6 }
  0x30   :  { %p1990_p9 = pnand %p1989_p8, %p1983_p5 }
  0x32   :  { %1993 = shalt.err (!%p1990_p9)
}
  0x33   :  { %s2029_s0 = smov 448   ;;  %s2030_s26 = smov 28  }
  0x34   :  { %47 = dma.hbm_to_vmem [thread:$0]  %s2160_s2, 14336, %s42_s17, [#allocation6], %s2029_s0, %s2029_s0, %s2030_s26  }
  0x35   :  { %2016 = dma.done.wait [#allocation3], 256  }
  0x36   :  { %2017 = vsyncadd [#allocation3], 4294967040 }
  0x37   :  { %2018 = dma.done.wait [#allocation6], 18432  }
  0x38   :  { %2019 = vsyncadd [#allocation6], 4294948864  ;;  %v2031_v0 = vmov 0.0   ;;  %vm2032_vm0 = vmmov 0   ;;  %v1700_v1 = vld [vmem:[#allocation5] ss:$16 sps:$4 sm:$0xff]  }
  0x39   :  { %1647 = vmatprep.subr.bf16.mxu0 %v2031_v0  ;;  %1663 = vmatprep.mubr.msk.bf16.mxu0 %vm2032_vm0, %v2031_v0  ;;  %v1701_v2 = vld [vmem:[#allocation5 + $0x20] ss:$16 sps:$4 sm:$0xff]   ;;  %v1708_v4 = vld [vmem:[#allocation5 + $0x4] ss:$16 sps:$4 sm:$0xff]   ;;  %v113_v15 = vld [vmem:[#allocation2 + $0x8] sm:$0xff]  ;;  %v2033_v46 = vmov 0  }
  0x3a   :  { %1667 = vmatprep.subr.bf16.mxu1 %v2031_v0  ;;  %1683 = vmatprep.mubr.msk.bf16.mxu1 %vm2032_vm0, %v2031_v0  ;;  %v1702_v3 = vld [vmem:[#allocation5 + $0x40] ss:$16 sps:$4 sm:$0xff]   ;;  %v1709_v6 = vld [vmem:[#allocation5 + $0x24] ss:$16 sps:$4 sm:$0xff]   ;;  %v1716_v20 = vld [vmem:[#allocation5 + $0x8] ss:$16 sps:$4 sm:$0xff]  }
  0x3b   :  { %1648 = vmatpush3.bf16.msra.mxu0 %v1700_v1  ;;  %v1703_v5 = vld [vmem:[#allocation5 + $0x60] ss:$16 sps:$4 sm:$0xff]   ;;  %1668 = vmatpush3.bf16.msra.mxu1 %v1708_v4  ;;  %v1710_v8 = vld [vmem:[#allocation5 + $0x44] ss:$16 sps:$4 sm:$0xff]   ;;  %v1718_v21 = vld [vmem:[#allocation5 + $0xc] ss:$16 sps:$4 sm:$0xff]  }
  0x3c   :  { %1649 = vmatprep.subr.bf16.mxu0 %v2031_v0  ;;  %1669 = vmatprep.subr.bf16.mxu1 %v2031_v0  ;;  %v1704_v7 = vld [vmem:[#allocation5 + $0x80] ss:$16 sps:$4 sm:$0xff]   ;;  %v1711_v10 = vld [vmem:[#allocation5 + $0x64] ss:$16 sps:$4 sm:$0xff]   ;;  %v1721_v22 = vld [vmem:[#allocation5 + $0x2c] ss:$16 sps:$4 sm:$0xff]  }
  0x3d   :  { %v1705_v9 = vld [vmem:[#allocation5 + $0xa0] ss:$16 sps:$4 sm:$0xff]   ;;  %v1712_v12 = vld [vmem:[#allocation5 + $0x84] ss:$16 sps:$4 sm:$0xff]   ;;  %v1719_v23 = vld [vmem:[#allocation5 + $0x28] ss:$16 sps:$4 sm:$0xff]  }
  0x3e   :  { %v1706_v11 = vld [vmem:[#allocation5 + $0xc0] ss:$16 sps:$4 sm:$0xff]   ;;  %v1713_v16 = vld [vmem:[#allocation5 + $0xa4] ss:$16 sps:$4 sm:$0xff]   ;;  %v1724_v24 = vld [vmem:[#allocation5 + $0x4c] ss:$16 sps:$4 sm:$0xff]  }
  0x3f   :  { %1650 = vmatpush3.bf16.msra.mxu0 %v1701_v2  ;;  %1670 = vmatpush3.bf16.msra.mxu1 %v1709_v6  ;;  %v1707_v13 = vld [vmem:[#allocation5 + $0xe0] ss:$16 sps:$4 sm:$0xff]   ;;  %v1714_v18 = vld [vmem:[#allocation5 + $0xc4] ss:$16 sps:$4 sm:$0xff]   ;;  %v1722_v25 = vld [vmem:[#allocation5 + $0x48] ss:$16 sps:$4 sm:$0xff]  }
  0x40   :  { %1651 = vmatprep.subr.bf16.mxu0 %v2031_v0  ;;  %1671 = vmatprep.subr.bf16.mxu1 %v2031_v0  ;;  %v112_v14 = vld [vmem:[#allocation2] sm:$0xff]  ;;  %v1727_v26 = vld [vmem:[#allocation5 + $0x6c] ss:$16 sps:$4 sm:$0xff]   ;;  %v1725_v27 = vld [vmem:[#allocation5 + $0x68] ss:$16 sps:$4 sm:$0xff]  }
  0x41   :  { %v114_v17 = vpack.c.bf16 %v113_v15, %v112_v14  ;;  %v1715_v19 = vld [vmem:[#allocation5 + $0xe4] ss:$16 sps:$4 sm:$0xff]   ;;  %v1730_v28 = vld [vmem:[#allocation5 + $0x8c] ss:$16 sps:$4 sm:$0xff]   ;;  %v1728_v29 = vld [vmem:[#allocation5 + $0x88] ss:$16 sps:$4 sm:$0xff]  }
  0x42   :  { %v1733_v30 = vld [vmem:[#allocation5 + $0xac] ss:$16 sps:$4 sm:$0xff]   ;;  %v1731_v31 = vld [vmem:[#allocation5 + $0xa8] ss:$16 sps:$4 sm:$0xff]   ;;  %v1445_v32 = vld [vmem:[%s2161_s3] ss:$0 sm:$0xff] }
  0x43   :  { %1652 = vmatpush3.bf16.msra.mxu0 %v1702_v3  ;;  %1672 = vmatpush3.bf16.msra.mxu1 %v1710_v8  ;;  %v1736_v42 = vld [vmem:[#allocation5 + $0xcc] ss:$16 sps:$4 sm:$0xff]   ;;  %v1734_v43 = vld [vmem:[#allocation5 + $0xc8] ss:$16 sps:$4 sm:$0xff]   ;;  %v1742_v48 = vld [vmem:[#allocation7 + $0x4] ss:$28 sps:$4 sm:$0xff]  }
  0x44   :  { %1653 = vmatprep.subr.bf16.mxu0 %v2031_v0  ;;  %1673 = vmatprep.subr.bf16.mxu1 %v2031_v0  ;;  %v1739_v44 = vld [vmem:[#allocation5 + $0xec] ss:$16 sps:$4 sm:$0xff]   ;;  %v1737_v45 = vld [vmem:[#allocation5 + $0xe8] ss:$16 sps:$4 sm:$0xff]   ;;  %v1754_v52 = vld [vmem:[#allocation7 + $0x74] ss:$28 sps:$4 sm:$0xff]  }
  0x45   :  { %v1740_v47 = vld [vmem:[#allocation7] ss:$28 sps:$4 sm:$0xff]   ;;  %v1745_v49 = vld [vmem:[#allocation7 + $0xc] ss:$28 sps:$4 sm:$0xff]   ;;  %v1746_v51 = vld [vmem:[#allocation7 + $0x38] ss:$28 sps:$4 sm:$0xff]  }
  0x46   :  { %v1748_v50 = vld [vmem:[#allocation7 + $0x3c] ss:$28 sps:$4 sm:$0xff]   ;;  %v1752_v53 = vld [vmem:[#allocation7 + $0x70] ss:$28 sps:$4 sm:$0xff]   ;;  %v1758_v55 = vld [vmem:[#allocation7 + $0xa8] ss:$28 sps:$4 sm:$0xff]  }
  0x47   :  { %1654 = vmatpush3.bf16.msra.mxu0 %v1703_v5  ;;  %1674 = vmatpush3.bf16.msra.mxu1 %v1711_v10  ;;  %v1760_v54 = vld [vmem:[#allocation7 + $0xac] ss:$28 sps:$4 sm:$0xff]   ;;  %v1766_v56 = vld [vmem:[#allocation7 + $0xe4] ss:$28 sps:$4 sm:$0xff]   ;;  %v1772_v58 = vld [vmem:[#allocation7 + $0x11c] ss:$28 sps:$4 sm:$0xff]  }
  0x48   :  { %1655 = vmatprep.subr.bf16.mxu0 %v2031_v0  ;;  %1675 = vmatprep.subr.bf16.mxu1 %v2031_v0  ;;  %v1764_v57 = vld [vmem:[#allocation7 + $0xe0] ss:$28 sps:$4 sm:$0xff]   ;;  %v1770_v59 = vld [vmem:[#allocation7 + $0x118] ss:$28 sps:$4 sm:$0xff]   ;;  %v1776_v61 = vld [vmem:[#allocation7 + $0x150] ss:$28 sps:$4 sm:$0xff]  }
  0x49   :  { %v1778_v60 = vld [vmem:[#allocation7 + $0x154] ss:$28 sps:$4 sm:$0xff]   ;;  %v1784_v62 = vld [vmem:[#allocation7 + $0x18c] ss:$28 sps:$4 sm:$0xff]   ;;  %v1788_v1 = vld [vmem:[#allocation7 + $0x1c0] ss:$28 sps:$4 sm:$0xff]  }
  0x4a   :  { %v1782_v63 = vld [vmem:[#allocation7 + $0x188] ss:$28 sps:$4 sm:$0xff]   ;;  %v1796_v2 = vld [vmem:[#allocation7 + $0x1fc] ss:$28 sps:$4 sm:$0xff]   ;;  %v1802_v4 = vld [vmem:[#allocation7 + $0x234] ss:$28 sps:$4 sm:$0xff]  }
  0x4b   :  { %1656 = vmatpush3.bf16.msra.mxu0 %v1704_v7  ;;  %1676 = vmatpush3.bf16.msra.mxu1 %v1712_v12  ;;  %v1794_v3 = vld [vmem:[#allocation7 + $0x1f8] ss:$28 sps:$4 sm:$0xff]   ;;  %v1800_v5 = vld [vmem:[#allocation7 + $0x230] ss:$28 sps:$4 sm:$0xff]   ;;  %v1806_v7 = vld [vmem:[#allocation7 + $0x268] ss:$28 sps:$4 sm:$0xff]  }
  0x4c   :  { %1657 = vmatprep.subr.bf16.mxu0 %v2031_v0  ;;  %1677 = vmatprep.subr.bf16.mxu1 %v2031_v0  ;;  %v1808_v6 = vld [vmem:[#allocation7 + $0x26c] ss:$28 sps:$4 sm:$0xff]   ;;  %v1814_v8 = vld [vmem:[#allocation7 + $0x2a4] ss:$28 sps:$4 sm:$0xff]   ;;  %v1820_v10 = vld [vmem:[#allocation7 + $0x2dc] ss:$28 sps:$4 sm:$0xff]  }
  0x4d   :  { %v1454_v12 = vld [vmem:[%s2161_s3 + $0x1] ss:$0 sm:$0xff] }
  0x4f   :  { %1658 = vmatpush3.bf16.msra.mxu0 %v1705_v9  ;;  %1678 = vmatpush3.bf16.msra.mxu1 %v1713_v16  ;;  %v1812_v9 = vld [vmem:[#allocation7 + $0x2a0] ss:$28 sps:$4 sm:$0xff]  }
  0x50   :  { %1659 = vmatprep.subr.bf16.mxu0 %v2031_v0  ;;  %1679 = vmatprep.subr.bf16.mxu1 %v2031_v0 }
  0x53   :  { %1660 = vmatpush3.bf16.msra.mxu0 %v1706_v11  ;;  %1680 = vmatpush3.bf16.msra.mxu1 %v1714_v18  ;;  %v1818_v11 = vld [vmem:[#allocation7 + $0x2d8] ss:$28 sps:$4 sm:$0xff]  }
  0x54   :  { %1661 = vmatprep.subr.bf16.mxu0 %v2031_v0  ;;  %1681 = vmatprep.subr.bf16.mxu1 %v2031_v0  ;;  %v1790_v0 = vld [vmem:[#allocation7 + $0x1c4] ss:$28 sps:$4 sm:$0xff]  }
  0x57   :  { %1662 = vmatpush3.bf16.msra.mxu0 %v1707_v13  ;;  %1682 = vmatpush3.bf16.msra.mxu1 %v1715_v19 }
  0x58   :  { %402 = vmatprep.subr.bf16.mxu0 %v1718_v21  ;;  %1191 = vmatprep.subr.bf16.mxu1 %v1742_v48  ;;  %v1743_v21 = vld [vmem:[#allocation7 + $0x8] ss:$28 sps:$4 sm:$0xff]   ;;  %v1821_v48 = vld [vmem:[#allocation7 + $0x2e0] ss:$28 sps:$4 sm:$0xff]  }
  0x5a   :  { %1664 = vmatmul.mubr.bf16.vlgmr.msra.gmra.mrb[0].mxu0 %v114_v17 }
  0x5b   :  { %403 = vmatpush1.bf16.msra.mxu0 %v1716_v20  ;;  %434 = vmatprep.mubr.bf16.mxu0 %v2033_v46  ;;  %v1815_v46 = vld [vmem:[#allocation7 + $0x2a8] ss:$28 sps:$4 sm:$0xff]  }
  0x5c   :  { %404 = vmatprep.subr.bf16.mxu0 %v1721_v22 }
  0x5f   :  { %405 = vmatpush1.bf16.msra.mxu0 %v1719_v23  ;;  %v1751_v23 = vld [vmem:[#allocation7 + $0x44] ss:$28 sps:$4 sm:$0xff]  }
  0x60   :  { %406 = vmatprep.subr.bf16.mxu0 %v1724_v24  ;;  %v1749_v24 = vld [vmem:[#allocation7 + $0x40] ss:$28 sps:$4 sm:$0xff]  }
  0x63   :  { %407 = vmatpush1.bf16.msra.mxu0 %v1722_v25  ;;  %v1757_v25 = vld [vmem:[#allocation7 + $0x7c] ss:$28 sps:$4 sm:$0xff]  }
  0x64   :  { %408 = vmatprep.subr.bf16.mxu0 %v1727_v26  ;;  %v1755_v26 = vld [vmem:[#allocation7 + $0x78] ss:$28 sps:$4 sm:$0xff]  }
  0x67   :  { %409 = vmatpush1.bf16.msra.mxu0 %v1725_v27  ;;  %v1763_v27 = vld [vmem:[#allocation7 + $0xb4] ss:$28 sps:$4 sm:$0xff]  }
  0x68   :  { %410 = vmatprep.subr.bf16.mxu0 %v1730_v28  ;;  %v1761_v28 = vld [vmem:[#allocation7 + $0xb0] ss:$28 sps:$4 sm:$0xff]  }
  0x6b   :  { %411 = vmatpush1.bf16.msra.mxu0 %v1728_v29  ;;  %v1769_v29 = vld [vmem:[#allocation7 + $0xec] ss:$28 sps:$4 sm:$0xff]  }
  0x6c   :  { %412 = vmatprep.subr.bf16.mxu0 %v1733_v30  ;;  %v1767_v30 = vld [vmem:[#allocation7 + $0xe8] ss:$28 sps:$4 sm:$0xff]  }
  0x6f   :  { %413 = vmatpush1.bf16.msra.mxu0 %v1731_v31  ;;  %v1775_v31 = vld [vmem:[#allocation7 + $0x124] ss:$28 sps:$4 sm:$0xff]  }
  0x70   :  { %414 = vmatprep.subr.bf16.mxu0 %v1736_v42  ;;  %v1803_v42 = vld [vmem:[#allocation7 + $0x238] ss:$28 sps:$4 sm:$0xff]  }
  0x73   :  { %415 = vmatpush1.bf16.msra.mxu0 %v1734_v43  ;;  %v1811_v43 = vld [vmem:[#allocation7 + $0x274] ss:$28 sps:$4 sm:$0xff]  }
  0x74   :  { %416 = vmatprep.subr.bf16.mxu0 %v1739_v44  ;;  %v1809_v44 = vld [vmem:[#allocation7 + $0x270] ss:$28 sps:$4 sm:$0xff]  }
  0x77   :  { %417 = vmatpush1.bf16.msra.mxu0 %v1737_v45  ;;  %v1817_v45 = vld [vmem:[#allocation7 + $0x2ac] ss:$28 sps:$4 sm:$0xff]  }
  0x78   :  { %1234 = vmatprep.subr.bf16.mxu0 %v1745_v49  ;;  %v1826_v49 = vld [vmem:[#allocation7 + $0x314] ss:$28 sps:$4 sm:$0xff]  }
 0x12d   :  { %v203_v33 = vpop.f32.mrb[0].mxu0 }
 0x12e   :  { %v204_v34 = vadd.f32 %v1445_v32, %v203_v33  ;;  %v1665_v35 = vpop.f32.mrb[1].mxu0  ;;  %v1781_v33 = vld [vmem:[#allocation7 + $0x15c] ss:$28 sps:$4 sm:$0xff]  }
 0x12f   :  { %v206_v36 = vpop.f32.mrb[2].mxu0  ;;  %v1787_v35 = vld [vmem:[#allocation7 + $0x194] ss:$28 sps:$4 sm:$0xff]  }
 0x130   :  { %v207_v37 = vadd.f32 %v1445_v32, %v206_v36  ;;  %v1666_v38 = vpop.f32.mrb[3].mxu0  ;;  %v210_v39 = vmax.f32 %v204_v34, 0.0  ;;  %v1773_v32 = vld [vmem:[#allocation7 + $0x120] ss:$28 sps:$4 sm:$0xff]   ;;  %v1779_v34 = vld [vmem:[#allocation7 + $0x158] ss:$28 sps:$4 sm:$0xff]  }
 0x131   :  { %v1785_v36 = vld [vmem:[#allocation7 + $0x190] ss:$28 sps:$4 sm:$0xff]   ;;  %v1791_v38 = vld [vmem:[#allocation7 + $0x1c8] ss:$28 sps:$4 sm:$0xff]  }
 0x132   :  { %v211_v40 = vmax.f32 %v207_v37, 0.0  ;;  %v1793_v37 = vld [vmem:[#allocation7 + $0x1cc] ss:$28 sps:$4 sm:$0xff]  }
 0x134   :  { %v212_v41 = vpack.c.bf16 %v211_v40, %v210_v39  ;;  %v1799_v39 = vld [vmem:[#allocation7 + $0x204] ss:$28 sps:$4 sm:$0xff]  }
 0x135   :  { %v1797_v40 = vld [vmem:[#allocation7 + $0x200] ss:$28 sps:$4 sm:$0xff]  }
 0x136   :  { %1684 = vmatmul.mubr.bf16.vlgmr.msra.gmra.mrb[0].mxu1 %v212_v41  ;;  %v1805_v41 = vld [vmem:[#allocation7 + $0x23c] ss:$28 sps:$4 sm:$0xff]  }
 0x137   :  { %1192 = vmatpush1.bf16.msra.mxu1 %v1740_v47  ;;  %v1823_v47 = vld [vmem:[#allocation7 + $0x2e4] ss:$28 sps:$4 sm:$0xff]  }
 0x138   :  { %1193 = vmatprep.subr.bf16.mxu1 %v1748_v50  ;;  %v1829_v50 = vld [vmem:[#allocation7 + $0x31c] ss:$28 sps:$4 sm:$0xff]  }
 0x13b   :  { %1194 = vmatpush1.bf16.msra.mxu1 %v1746_v51  ;;  %v1824_v51 = vld [vmem:[#allocation7 + $0x310] ss:$28 sps:$4 sm:$0xff]  }
 0x13c   :  { %1195 = vmatprep.subr.bf16.mxu1 %v1754_v52  ;;  %v1827_v52 = vld [vmem:[#allocation7 + $0x318] ss:$28 sps:$4 sm:$0xff]  }
 0x13f   :  { %1196 = vmatpush1.bf16.msra.mxu1 %v1752_v53  ;;  %v1832_v53 = vld [vmem:[#allocation7 + $0x34c] ss:$28 sps:$4 sm:$0xff]  }
 0x140   :  { %1197 = vmatprep.subr.bf16.mxu1 %v1760_v54  ;;  %v1835_v54 = vld [vmem:[#allocation7 + $0x354] ss:$28 sps:$4 sm:$0xff]  }
 0x143   :  { %1198 = vmatpush1.bf16.msra.mxu1 %v1758_v55  ;;  %v1830_v55 = vld [vmem:[#allocation7 + $0x348] ss:$28 sps:$4 sm:$0xff]  }
 0x144   :  { %1199 = vmatprep.subr.bf16.mxu1 %v1766_v56  ;;  %v1833_v56 = vld [vmem:[#allocation7 + $0x350] ss:$28 sps:$4 sm:$0xff]  }
 0x147   :  { %1200 = vmatpush1.bf16.msra.mxu1 %v1764_v57  ;;  %v1838_v57 = vld [vmem:[#allocation7 + $0x14] ss:$28 sps:$4 sm:$0xff]  }
 0x148   :  { %1201 = vmatprep.subr.bf16.mxu1 %v1772_v58  ;;  %v1839_v58 = vld [vmem:[#allocation7 + $0x1d8] ss:$28 sps:$4 sm:$0xff]  }
 0x14b   :  { %1202 = vmatpush1.bf16.msra.mxu1 %v1770_v59  ;;  %v312_v59 = vlaneseq }
 0x14c   :  { %1203 = vmatprep.subr.bf16.mxu1 %v1778_v60 }
 0x14d   :  { %v2105_v60 = vshrl.u32 %v312_v59, 7  ;;  %v1894_v59 = vld [vmem:[#allocation7 + $0x320] ss:$28 sps:$4 sm:$0xff]  }
 0x14f   :  { %1204 = vmatpush1.bf16.msra.mxu1 %v1776_v61  ;;  %v314_v61 = vsub.s32 0, %v2105_v60 }
 0x150   :  { %1205 = vmatprep.subr.bf16.mxu1 %v1784_v62  ;;  %v110_v62 = vld [vmem:[%s2161_s3 + $0x2] sm:$0x3] }
 0x153   :  { %1206 = vmatpush1.bf16.msra.mxu1 %v1782_v63  ;;  %v318_v63 = vsub.s32 1, %v2105_v60 }
 0x154   :  { %1207 = vmatprep.subr.bf16.mxu1 %v1790_v0  ;;  %v315_v0 = vrot.slane %v110_v62, %v314_v61 }
 0x157   :  { %1208 = vmatpush1.bf16.msra.mxu1 %v1788_v1  ;;  %v319_v1 = vrot.slane %v110_v62, %v318_v63  ;;  %v1899_v62 = vld [vmem:[#allocation7 + $0x35c] ss:$28 sps:$4 sm:$0xff]  }
 0x158   :  { %1209 = vmatprep.subr.bf16.mxu1 %v1796_v2 }
 0x15b   :  { %1210 = vmatpush1.bf16.msra.mxu1 %v1794_v3 }
 0x15c   :  { %1211 = vmatprep.subr.bf16.mxu1 %v1802_v4 }
 0x15f   :  { %1212 = vmatpush1.bf16.msra.mxu1 %v1800_v5 }
 0x160   :  { %1213 = vmatprep.subr.bf16.mxu1 %v1808_v6 }
 0x163   :  { %1214 = vmatpush1.bf16.msra.mxu1 %v1806_v7 }
 0x164   :  { %1215 = vmatprep.subr.bf16.mxu1 %v1814_v8 }
 0x167   :  { %1216 = vmatpush1.bf16.msra.mxu1 %v1812_v9 }
 0x168   :  { %1217 = vmatprep.subr.bf16.mxu1 %v1820_v10 }
 0x16b   :  { %1218 = vmatpush1.bf16.msra.mxu1 %v1818_v11 }
 0x16c   :  { %1219 = vmatprep.subr.bf16.mxu1 %v1826_v49  ;;  %v1879_v49 = vld [vmem:[#allocation7 + $0x208] ss:$28 sps:$4 sm:$0xff]  }
 0x16f   :  { %1220 = vmatpush1.bf16.msra.mxu1 %v1824_v51  ;;  %v1882_v51 = vld [vmem:[#allocation7 + $0x240] ss:$28 sps:$4 sm:$0xff]  }
 0x170   :  { %1221 = vmatprep.subr.bf16.mxu1 %v1832_v53  ;;  %v1885_v53 = vld [vmem:[#allocation7 + $0x278] ss:$28 sps:$4 sm:$0xff]  }
 0x173   :  { %1222 = vmatpush1.bf16.msra.mxu1 %v1830_v55  ;;  %v1888_v55 = vld [vmem:[#allocation7 + $0x2b0] ss:$28 sps:$4 sm:$0xff]  }
 0x174   :  { %1277 = vmatprep.subr.bf16.mxu1 %v1838_v57  ;;  %v1891_v57 = vld [vmem:[#allocation7 + $0x2e8] ss:$28 sps:$4 sm:$0xff]  }
 0x209   :  { %v301_v13 = vpop.f32.mrb[0].mxu1 }
 0x20a   :  { %v302_v14 = vadd.f32 %v1454_v12, %v301_v13  ;;  %v1685_v15 = vpop.f32.mrb[1].mxu1 }
 0x20b   :  { %v304_v16 = vpop.f32.mrb[2].mxu1 }
 0x20c   :  { %v305_v17 = vadd.f32 %v1454_v12, %v304_v16  ;;  %v1686_v18 = vpop.f32.mrb[3].mxu1  ;;  %v308_v19 = vmax.f32 %v302_v14, 0.0  ;;  %v1836_v16 = vld [vmem:[#allocation7 + $0x10] ss:$28 sps:$4 sm:$0xff]  }
 0x20d   :  { %v1843_v18 = vld [vmem:[#allocation7 + $0x4c] ss:$28 sps:$4 sm:$0xff]  }
 0x20e   :  { %v309_v20 = vmax.f32 %v305_v17, 0.0  ;;  %v1840_v17 = vld [vmem:[#allocation7 + $0x18] ss:$28 sps:$4 sm:$0xff]  }
 0x210   :  { %v310_v22 = vpack.c.bf16 %v309_v20, %v308_v19  ;;  %v1844_v19 = vld [vmem:[#allocation7 + $0x210] ss:$28 sps:$4 sm:$0xff]   ;;  %v1841_v20 = vld [vmem:[#allocation7 + $0x48] ss:$28 sps:$4 sm:$0xff]  }
 0x212   :  { %435 = vmatmul.mubr.bf16.vlgmr.msra.gmra.mrb[4].mxu0 %v310_v22  ;;  %v1848_v22 = vld [vmem:[#allocation7 + $0x84] ss:$28 sps:$4 sm:$0xff]  }
 0x213   :  { %1235 = vmatpush1.bf16.msra.mxu0 %v1743_v21  ;;  %v1845_v21 = vld [vmem:[#allocation7 + $0x50] ss:$28 sps:$4 sm:$0xff]  }
 0x214   :  { %1236 = vmatprep.subr.bf16.mxu0 %v1751_v23  ;;  %v1849_v23 = vld [vmem:[#allocation7 + $0x248] ss:$28 sps:$4 sm:$0xff]  }
 0x217   :  { %1237 = vmatpush1.bf16.msra.mxu0 %v1749_v24  ;;  %v1846_v24 = vld [vmem:[#allocation7 + $0x80] ss:$28 sps:$4 sm:$0xff]  }
 0x218   :  { %1238 = vmatprep.subr.bf16.mxu0 %v1757_v25  ;;  %v1850_v25 = vld [vmem:[#allocation7 + $0x88] ss:$28 sps:$4 sm:$0xff]  }
 0x21b   :  { %1239 = vmatpush1.bf16.msra.mxu0 %v1755_v26  ;;  %v1853_v26 = vld [vmem:[#allocation7 + $0xbc] ss:$28 sps:$4 sm:$0xff]  }
 0x21c   :  { %1240 = vmatprep.subr.bf16.mxu0 %v1763_v27  ;;  %v1854_v27 = vld [vmem:[#allocation7 + $0x280] ss:$28 sps:$4 sm:$0xff]  }
 0x21f   :  { %1241 = vmatpush1.bf16.msra.mxu0 %v1761_v28  ;;  %v1851_v28 = vld [vmem:[#allocation7 + $0xb8] ss:$28 sps:$4 sm:$0xff]  }
 0x220   :  { %1242 = vmatprep.subr.bf16.mxu0 %v1769_v29  ;;  %v1855_v29 = vld [vmem:[#allocation7 + $0xc0] ss:$28 sps:$4 sm:$0xff]  }
 0x223   :  { %1243 = vmatpush1.bf16.msra.mxu0 %v1767_v30  ;;  %v1858_v30 = vld [vmem:[#allocation7 + $0xf4] ss:$28 sps:$4 sm:$0xff]  }
 0x224   :  { %1244 = vmatprep.subr.bf16.mxu0 %v1775_v31  ;;  %v1859_v31 = vld [vmem:[#allocation7 + $0x2b8] ss:$28 sps:$4 sm:$0xff]  }
 0x227   :  { %1245 = vmatpush1.bf16.msra.mxu0 %v1773_v32  ;;  %v1856_v32 = vld [vmem:[#allocation7 + $0xf0] ss:$28 sps:$4 sm:$0xff]  }
 0x228   :  { %1246 = vmatprep.subr.bf16.mxu0 %v1781_v33  ;;  %v1860_v33 = vld [vmem:[#allocation7 + $0xf8] ss:$28 sps:$4 sm:$0xff]  }
 0x22b   :  { %1247 = vmatpush1.bf16.msra.mxu0 %v1779_v34  ;;  %v1863_v34 = vld [vmem:[#allocation7 + $0x12c] ss:$28 sps:$4 sm:$0xff]  }
 0x22c   :  { %1248 = vmatprep.subr.bf16.mxu0 %v1787_v35  ;;  %v1864_v35 = vld [vmem:[#allocation7 + $0x2f0] ss:$28 sps:$4 sm:$0xff]  }
 0x22f   :  { %1249 = vmatpush1.bf16.msra.mxu0 %v1785_v36  ;;  %v1861_v36 = vld [vmem:[#allocation7 + $0x128] ss:$28 sps:$4 sm:$0xff]  }
 0x230   :  { %1250 = vmatprep.subr.bf16.mxu0 %v1793_v37  ;;  %v1865_v37 = vld [vmem:[#allocation7 + $0x130] ss:$28 sps:$4 sm:$0xff]  }
 0x233   :  { %1251 = vmatpush1.bf16.msra.mxu0 %v1791_v38  ;;  %v1868_v38 = vld [vmem:[#allocation7 + $0x164] ss:$28 sps:$4 sm:$0xff]  }
 0x234   :  { %1252 = vmatprep.subr.bf16.mxu0 %v1799_v39  ;;  %v1869_v39 = vld [vmem:[#allocation7 + $0x328] ss:$28 sps:$4 sm:$0xff]  }
 0x237   :  { %1253 = vmatpush1.bf16.msra.mxu0 %v1797_v40  ;;  %v1866_v40 = vld [vmem:[#allocation7 + $0x160] ss:$28 sps:$4 sm:$0xff]  }
 0x238   :  { %1254 = vmatprep.subr.bf16.mxu0 %v1805_v41  ;;  %v1870_v41 = vld [vmem:[#allocation7 + $0x168] ss:$28 sps:$4 sm:$0xff]  }
 0x23b   :  { %1255 = vmatpush1.bf16.msra.mxu0 %v1803_v42  ;;  %v1873_v42 = vld [vmem:[#allocation7 + $0x19c] ss:$28 sps:$4 sm:$0xff]  }
 0x23c   :  { %1256 = vmatprep.subr.bf16.mxu0 %v1811_v43  ;;  %v1874_v43 = vld [vmem:[#allocation7 + $0x360] ss:$28 sps:$4 sm:$0xff]  }
 0x23f   :  { %1257 = vmatpush1.bf16.msra.mxu0 %v1809_v44  ;;  %v1871_v44 = vld [vmem:[#allocation7 + $0x198] ss:$28 sps:$4 sm:$0xff]  }
 0x240   :  { %1258 = vmatprep.subr.bf16.mxu0 %v1817_v45  ;;  %v1875_v45 = vld [vmem:[#allocation7 + $0x1a0] ss:$28 sps:$4 sm:$0xff]  }
 0x243   :  { %1259 = vmatpush1.bf16.msra.mxu0 %v1815_v46  ;;  %v1878_v46 = vld [vmem:[#allocation7 + $0x1d4] ss:$28 sps:$4 sm:$0xff]  }
 0x244   :  { %1260 = vmatprep.subr.bf16.mxu0 %v1823_v47  ;;  %v1876_v47 = vld [vmem:[#allocation7 + $0x1d0] ss:$28 sps:$4 sm:$0xff]  }
 0x247   :  { %1261 = vmatpush1.bf16.msra.mxu0 %v1821_v48  ;;  %v1881_v48 = vld [vmem:[#allocation7 + $0x20c] ss:$28 sps:$4 sm:$0xff]  }
 0x248   :  { %1262 = vmatprep.subr.bf16.mxu0 %v1829_v50  ;;  %v1884_v50 = vld [vmem:[#allocation7 + $0x244] ss:$28 sps:$4 sm:$0xff]  }
 0x24b   :  { %1263 = vmatpush1.bf16.msra.mxu0 %v1827_v52  ;;  %v1887_v52 = vld [vmem:[#allocation7 + $0x27c] ss:$28 sps:$4 sm:$0xff]  }
 0x24c   :  { %1264 = vmatprep.subr.bf16.mxu0 %v1835_v54  ;;  %v1890_v54 = vld [vmem:[#allocation7 + $0x2b4] ss:$28 sps:$4 sm:$0xff]  }
 0x24f   :  { %1265 = vmatpush1.bf16.msra.mxu0 %v1833_v56  ;;  %v1893_v56 = vld [vmem:[#allocation7 + $0x2ec] ss:$28 sps:$4 sm:$0xff]  }
 0x250   :  { %1625 = vmatprep.subr.bf16.mxu0 %v1839_v58  ;;  %v1896_v58 = vld [vmem:[#allocation7 + $0x324] ss:$28 sps:$4 sm:$0xff]  }
 0x2e5   :  { %v436_v2 = vpop.f32.mrb[4].mxu0 }
 0x2e6   :  { %v437_v3 = vadd.f32 %v436_v2, %v315_v0  ;;  %v438_v4 = vpop.f32.mrb[5].mxu0  ;;  %v2126_v2 = vld [vmem:[%s2161_s3 + $0x4] sm:$0xff]  ;;  %s2034_s3 = smov [#allocation8]  }
 0x2e7   :  { %v439_v5 = vadd.f32 %v438_v4, %v319_v1  ;;  %v440_v6 = vpop.f32.mrb[6].mxu0  ;;  %v583_v4 = vrot.slane %v2126_v2, %v314_v61  ;;  %s1432_s10 = sshll.u32 %s2034_s3, 4  ;;  %s1433_s10 = int_to_ptr.vmem [resolvable:$true] %s1432_s10 }
 0x2e8   :  { %v441_v7 = vadd.f32 %v440_v6, %v315_v0  ;;  %v442_v8 = vpop.f32.mrb[7].mxu0  ;;  %v445_v10 = vmax.f32 %v437_v3, 0.0  ;;  %v1897_v0 = vld [vmem:[#allocation7 + $0x358] ss:$28 sps:$4 sm:$0xff]   ;;  %v594_v3 = vsub.s32 3, %v2105_v60  ;;  %v587_v6 = vrot.slane %v2126_v2, %v318_v63  ;;  %s1994_s11 = scalar_lea.vmem %s1433_s10, 896  ;;  %p1999_p11 = scmp.lt.s32.totalorder %s1433_s10, %s1433_s10 }
 0x2e9   :  { %v443_v9 = vadd.f32 %v442_v8, %v319_v1  ;;  %v446_v12 = vmax.f32 %v439_v5, 0.0  ;;  %v590_v1 = vsub.s32 2, %v2105_v60  ;;  %p1995_p10 = scmp.ne.s32.totalorder %s1433_s10, %s1994_s11  ;;  %p2000_p12 = scmp.lt.s32.totalorder %s1994_s11, %s1994_s11 }
 0x2ea   :  { %v447_v11 = vmax.f32 %v441_v7, 0.0  ;;  %v595_v7 = vrot.slane %v2126_v2, %v594_v3 }
 0x2eb   :  { %v448_v13 = vmax.f32 %v443_v9, 0.0  ;;  %v591_v5 = vrot.slane %v2126_v2, %v590_v1  ;;  %p2001_p13 = por %p2000_p12, %p1999_p11 }
 0x2ec   :  { %v2116_v14 = vpack.c.bf16 %v447_v11, %v445_v10 }
 0x2ed   :  { %v450_v15 = vpack.c.bf16 %v448_v13, %v446_v12  ;;  %p2002_p0 = pnand %p2001_p13, %p1995_p10 }
 0x2ef   :  { %1223 = vmatprep.mubr.bf16.mxu1 %v450_v15  ;;  %1266 = vmatprep.mubr.bf16.mxu0 %v450_v15 }
 0x2f0   :  { %1224 = vmatmul.mubr.bf16.vlgmr.msra.gmra.mrb[4].mxu1 %v2116_v14  ;;  %1267 = vmatmul.mubr.bf16.vlgmr.msra.gmra.mrb[8].mxu0 %v2116_v14 }
 0x2f1   :  { %1278 = vmatpush1.bf16.msra.mxu1 %v1836_v16  ;;  %1626 = vmatpush3.bf16.msra.mxu0 %v1840_v17 }
 0x2f2   :  { %1309 = vmatprep.mubr.bf16.mxu1 %v450_v15  ;;  %1352 = vmatprep.mubr.bf16.mxu0 %v450_v15 }
 0x2f3   :  { %1279 = vmatprep.subr.bf16.mxu1 %v1843_v18  ;;  %1627 = vmatprep.subr.bf16.mxu0 %v1844_v19 }
 0x2f5   :  { %1280 = vmatpush1.bf16.msra.mxu1 %v1841_v20  ;;  %1628 = vmatpush3.bf16.msra.mxu0 %v1845_v21 }
 0x2f6   :  { %1281 = vmatprep.subr.bf16.mxu1 %v1848_v22  ;;  %1629 = vmatprep.subr.bf16.mxu0 %v1849_v23 }
 0x2f9   :  { %1282 = vmatpush1.bf16.msra.mxu1 %v1846_v24  ;;  %1630 = vmatpush3.bf16.msra.mxu0 %v1850_v25 }
 0x2fa   :  { %1283 = vmatprep.subr.bf16.mxu1 %v1853_v26  ;;  %1631 = vmatprep.subr.bf16.mxu0 %v1854_v27 }
 0x2fd   :  { %1284 = vmatpush1.bf16.msra.mxu1 %v1851_v28  ;;  %1632 = vmatpush3.bf16.msra.mxu0 %v1855_v29 }
 0x2fe   :  { %1285 = vmatprep.subr.bf16.mxu1 %v1858_v30  ;;  %1633 = vmatprep.subr.bf16.mxu0 %v1859_v31 }
 0x301   :  { %1286 = vmatpush1.bf16.msra.mxu1 %v1856_v32  ;;  %1634 = vmatpush3.bf16.msra.mxu0 %v1860_v33 }
 0x302   :  { %1287 = vmatprep.subr.bf16.mxu1 %v1863_v34  ;;  %1635 = vmatprep.subr.bf16.mxu0 %v1864_v35  ;;  %v606_v34 = vsub.s32 6, %v2105_v60 }
 0x305   :  { %1288 = vmatpush1.bf16.msra.mxu1 %v1861_v36  ;;  %1636 = vmatpush3.bf16.msra.mxu0 %v1865_v37  ;;  %v607_v36 = vrot.slane %v2126_v2, %v606_v34 }
 0x306   :  { %1289 = vmatprep.subr.bf16.mxu1 %v1868_v38  ;;  %1637 = vmatprep.subr.bf16.mxu0 %v1869_v39 }
 0x309   :  { %1290 = vmatpush1.bf16.msra.mxu1 %v1866_v40  ;;  %1638 = vmatpush3.bf16.msra.mxu0 %v1870_v41 }
 0x30a   :  { %1291 = vmatprep.subr.bf16.mxu1 %v1873_v42  ;;  %1639 = vmatprep.subr.bf16.mxu0 %v1874_v43 }
 0x30d   :  { %1292 = vmatpush1.bf16.msra.mxu1 %v1871_v44  ;;  %1640 = vmatpush3.bf16.msra.mxu0 %v1875_v45 }
 0x30e   :  { %1293 = vmatprep.subr.bf16.mxu1 %v1878_v46 }
 0x310   :  { %1353 = vmatmul.mubr.bf16.vlgmr.msra.gmra.mrb[12].mxu0 %v2116_v14 }
 0x311   :  { %1294 = vmatpush1.bf16.msra.mxu1 %v1876_v47 }
 0x312   :  { %1295 = vmatprep.subr.bf16.mxu1 %v1881_v48  ;;  %v598_v48 = vsub.s32 4, %v2105_v60 }
 0x315   :  { %1296 = vmatpush1.bf16.msra.mxu1 %v1879_v49  ;;  %v602_v49 = vsub.s32 5, %v2105_v60 }
 0x316   :  { %1297 = vmatprep.subr.bf16.mxu1 %v1884_v50  ;;  %v599_v50 = vrot.slane %v2126_v2, %v598_v48 }
 0x319   :  { %1298 = vmatpush1.bf16.msra.mxu1 %v1882_v51  ;;  %v603_v51 = vrot.slane %v2126_v2, %v602_v49 }
 0x31a   :  { %1299 = vmatprep.subr.bf16.mxu1 %v1887_v52 }
 0x31d   :  { %1300 = vmatpush1.bf16.msra.mxu1 %v1885_v53 }
 0x31e   :  { %1301 = vmatprep.subr.bf16.mxu1 %v1890_v54 }
 0x321   :  { %1302 = vmatpush1.bf16.msra.mxu1 %v1888_v55 }
 0x322   :  { %1303 = vmatprep.subr.bf16.mxu1 %v1893_v56 }
 0x325   :  { %1304 = vmatpush1.bf16.msra.mxu1 %v1891_v57 }
 0x326   :  { %1305 = vmatprep.subr.bf16.mxu1 %v1896_v58 }
 0x329   :  { %1306 = vmatpush1.bf16.msra.mxu1 %v1894_v59 }
 0x32a   :  { %1307 = vmatprep.subr.bf16.mxu1 %v1899_v62 }
 0x32d   :  { %1308 = vmatpush1.bf16.msra.mxu1 %v1897_v0 }
 0x330   :  { %1310 = vmatmul.mubr.bf16.vlgmr.msra.gmra.mrb[8].mxu1 %v2116_v14 }
 0x3c3   :  { %v1225_v8 = vpop.f32.mrb[4].mxu1  ;;  %v1268_v9 = vpop.f32.mrb[8].mxu0 }
 0x3c4   :  { %v1226_v10 = vadd.f32 %v1225_v8, %v583_v4  ;;  %v1269_v11 = vadd.f32 %v1268_v9, %v591_v5  ;;  %v1227_v12 = vpop.f32.mrb[5].mxu1  ;;  %v1270_v13 = vpop.f32.mrb[9].mxu0 }
 0x3c5   :  { %v1228_v14 = vadd.f32 %v1227_v12, %v587_v6  ;;  %v1271_v15 = vadd.f32 %v1270_v13, %v595_v7  ;;  %v1229_v16 = vpop.f32.mrb[6].mxu1  ;;  %v1272_v17 = vpop.f32.mrb[10].mxu0 }
 0x3c6   :  { %1900 = vtanh.f32 %v1226_v10  ;;  %v1230_v61 = vadd.f32 %v1229_v16, %v583_v4  ;;  %v1231_v18 = vpop.f32.mrb[7].mxu1  ;;  %v1274_v19 = vpop.f32.mrb[11].mxu0  ;;  %v1273_v20 = vadd.f32 %v1272_v17, %v591_v5 }
 0x3c7   :  { %1902 = vtanh.f32 %v1269_v11  ;;  %v1232_v63 = vadd.f32 %v1231_v18, %v587_v6  ;;  %v1275_v21 = vadd.f32 %v1274_v19, %v595_v7 }
 0x3c8   :  { %1904 = vtanh.f32 %v1228_v14 }
 0x3c9   :  { %1906 = vtanh.f32 %v1271_v15 }
 0x3ca   :  { %1908 = vtanh.f32 %v1230_v61 }
 0x3cb   :  { %1910 = vtanh.f32 %v1273_v20 }
 0x3cc   :  { %1912 = vtanh.f32 %v1232_v63 }
 0x3cd   :  { %1914 = vtanh.f32 %v1275_v21 }
 0x3d0   :  { %v1901_v22 = vpop.eup %1900 }
 0x3d1   :  { %v1903_v23 = vpop.eup %1902 }
 0x3d2   :  { %v1905_v24 = vpop.eup %1904 }
 0x3d3   :  { %v1907_v25 = vpop.eup %1906  ;;  %v1599_v26 = vpack.c.bf16 %v1905_v24, %v1901_v22 }
 0x3d4   :  { %v1909_v27 = vpop.eup %1908  ;;  %v1600_v28 = vpack.c.bf16 %v1907_v25, %v1903_v23 }
 0x3d5   :  { %v1911_v29 = vpop.eup %1910  ;;  %1419 = vst [vmem:[#allocation8] sm:$0xff] %v1599_v26 }
 0x3d6   :  { %v1913_v30 = vpop.eup %1912  ;;  %1420 = vst [vmem:[#allocation8 + $0x8] sm:$0xff] %v1600_v28 }
 0x3d7   :  { %v1915_v31 = vpop.eup %1914  ;;  %v1603_v32 = vpack.c.bf16 %v1913_v30, %v1909_v27 }
 0x3d8   :  { %v1604_v33 = vpack.c.bf16 %v1915_v31, %v1911_v29 }
 0x3d9   :  { %1423 = vst [vmem:[#allocation8 + $0x1c] sm:$0xff] %v1603_v32 }
 0x3da   :  { %1424 = vst [vmem:[#allocation8 + $0x24] sm:$0xff] %v1604_v33 }
 0x3e3   :  { %v1641_v35 = vpop.f32.mrb[12].mxu0 }
 0x3e4   :  { %v1642_v37 = vpop.f32.mrb[13].mxu0 }
 0x3e5   :  { %v1643_v38 = vadd.f32 %v1642_v37, %v1641_v35  ;;  %v1644_v39 = vpop.f32.mrb[14].mxu0 }
 0x3e6   :  { %v1645_v40 = vpop.f32.mrb[15].mxu0 }
 0x3e7   :  { %v1355_v41 = vadd.f32 %v1643_v38, %v607_v36  ;;  %v1646_v42 = vadd.f32 %v1645_v40, %v1644_v39 }
 0x3e9   :  { %1916 = vtanh.f32 %v1355_v41  ;;  %v1358_v43 = vadd.f32 %v1646_v42, %v607_v36 }
 0x3eb   :  { %1918 = vtanh.f32 %v1358_v43 }
 0x3f3   :  { %v1917_v44 = vpop.eup %1916 }
 0x3f4   :  { %v1602_v45 = vpack.c.bf16 %v1917_v44, %v1917_v44 }
 0x3f5   :  { %v1919_v46 = vpop.eup %1918 }
 0x3f6   :  { %1422 = vst [vmem:[#allocation8 + $0x18] sm:$0xf] %v1602_v45  ;;  %v1606_v47 = vpack.c.bf16 %v1919_v46, %v1919_v46 }
 0x3f8   :  { %1426 = vst [vmem:[#allocation8 + $0x34] sm:$0xf] %v1606_v47 }
 0x403   :  { %v1311_v52 = vpop.f32.mrb[8].mxu1 }
 0x404   :  { %v1312_v53 = vadd.f32 %v1311_v52, %v599_v50  ;;  %v1313_v54 = vpop.f32.mrb[9].mxu1 }
 0x405   :  { %v1314_v55 = vadd.f32 %v1313_v54, %v603_v51  ;;  %v1315_v56 = vpop.f32.mrb[10].mxu1 }
 0x406   :  { %1920 = vtanh.f32 %v1312_v53  ;;  %v1316_v57 = vadd.f32 %v1315_v56, %v599_v50  ;;  %v1317_v58 = vpop.f32.mrb[11].mxu1 }
 0x407   :  { %1922 = vtanh.f32 %v1314_v55  ;;  %v1318_v59 = vadd.f32 %v1317_v58, %v603_v51 }
 0x408   :  { %1924 = vtanh.f32 %v1316_v57 }
 0x409   :  { %1926 = vtanh.f32 %v1318_v59 }
 0x410   :  { %v1921_v62 = vpop.eup %1920 }
 0x411   :  { %v1923_v0 = vpop.eup %1922 }
 0x412   :  { %v1925_v60 = vpop.eup %1924  ;;  %v1601_v1 = vpack.c.bf16 %v1923_v0, %v1921_v62 }
 0x413   :  { %v1927_v3 = vpop.eup %1926 }
 0x414   :  { %1421 = vst [vmem:[#allocation8 + $0x10] sm:$0xff] %v1601_v1  ;;  %v1605_v2 = vpack.c.bf16 %v1927_v3, %v1925_v60 }
 0x416   :  { %1425 = vst [vmem:[#allocation8 + $0x2c] sm:$0xff] %v1605_v2 }
 0x417   :  { %2005 = shalt.err (!%p2002_p0)
}
 0x418   :  { %s2006_s13 = scalar_lea.hbm %s2162_s4, 896 }
 0x419   :  { %p2007_p1 = scmp.ne.s32.totalorder %s2162_s4, %s2006_s13  ;;  %p2010_p2 = scmp.lt.u32.totalorder %s2006_s13, %s2162_s4 }
 0x41b   :  { %p2012_p3 = pnand %p2010_p2, %p2007_p1 }
 0x41d   :  { %2015 = shalt.err (!%p2012_p3)
}
 0x41e   :  { %1438 = dma.vmem_to_hbm [thread:$0]  %s1433_s10, 896, %s2162_s4, [#allocation4], %s2029_s0, %s2029_s0, %s2030_s26  }
 0x41f   :  { %2020 = dma.done.wait [#allocation4], 896  }
 0x420   :  { %2021 = vsyncadd [#allocation4], 4294966400 }
 0x421   :  { %1442 = vsyncpa [#allocation3], 1 }
 0x422   :  { %1443 = vsyncpa [#allocation6], 1 }
 0x423   :  { %1444 = vsyncpa [#allocation4], 1 }

</bundles_post_ra>
